<compile_context>
chip_gen: v6e
topology: v6e:2x2x1
jax: 0.10.0
libtpu: 0.0.40
codegen_flags: <defaults>
</compile_context>

<pallas_src>
import jax
import jax.numpy as jnp
from jax.experimental import pallas as pl
from jax.experimental.pallas import tpu as pltpu


def _round_up(x, m):
    return -(-x // m) * m


def _lsa_kernel(qT_ref, mem_ref, pmemT_ref, x2k_ref, bias_ref, sel_ref,
                wqT_ref, wfT_ref, wvT_ref, r_ref,
                ctx_ref, attw_ref):
    Bb, Tp, _ = mem_ref.shape
    N = Bb * Tp                                     # flattened (row, time) lane axis

    # Query projection for the whole batch block: (A, RNN) @ (RNN, Bb) -> (A, Bb).
    pq = jnp.dot(wqT_ref[...], qT_ref[0], preferred_element_type=jnp.float32)

    # Broadcast pq over each row's Tp-chunk of the flattened lane axis with a
    # one-hot selector matmul: sel[b, b*Tp + t] == 1.   (A, Bb) @ (Bb, N) -> (A, N)
    pqb = jnp.dot(pq.astype(jnp.bfloat16), sel_ref[...],
                  preferred_element_type=jnp.float32)

    # Fused Conv1d(2->F, K taps) + Linear(F->A) over the WHOLE block:
    # a single MXU matmul (A, KCp) @ (KCp, Bb*Tp), bf16 x bf16 -> f32.
    pa = jnp.dot(wfT_ref[...], x2k_ref[0], preferred_element_type=jnp.float32)

    # ONE tanh over the whole block (EUP).
    h = jnp.tanh(pa + pqb + pmemT_ref[0].astype(jnp.float32))        # (A, N)

    # ONE energies matmul; padding + user mask folded in as an additive bias.
    e = (jnp.dot(wvT_ref[...], h, preferred_element_type=jnp.float32)
         + r_ref[...] + bias_ref[0])                                 # (1, N)

    # Per-row softmax over the lane axis + context matmul; dense (Bb, .) outputs.
    for b in range(Bb):                               # static, small per-row work only
        eb = e[:, b * Tp:(b + 1) * Tp]                               # (1, Tp)
        m = jnp.max(eb, axis=-1, keepdims=True)
        p = jnp.exp(eb - m)
        s = jnp.sum(p, axis=-1, keepdims=True)
        w = p / s                       # exact normalization (weights sum to 1)
        ctx = jnp.dot(w.astype(jnp.bfloat16), mem_ref[b],
                      preferred_element_type=jnp.float32)            # (1, E)
        attw_ref[b:b + 1, :] = w
        ctx_ref[b:b + 1, :] = ctx


def _vmem_capacity_bytes():
    try:
        info = pltpu.get_tpu_info()
        cap = getattr(info, "vmem_capacity_bytes", None)
        if cap:
            return int(cap)
    except Exception:
        pass
    return 64 * 2 ** 20              # conservative (v7x-class) fallback


def _choose_block_b(B, per_b_stream, per_b_scratch, vmem_bytes):
    small_vmem = vmem_bytes <= 96 * 2 ** 20            # v7x-class: 64 MiB / TensorCore
    # total per-step VMEM ~ double-buffered streams + f32 intermediates
    cap = int(vmem_bytes * (0.55 if small_vmem else 0.60))
    per_b_total = 2 * per_b_stream + per_b_scratch
    bb = max(8, (cap // max(per_b_total, 1)) // 8 * 8)
    # absolute single-copy stream budget: ~8 MiB on v7x, ~24 MiB on v5e/v6e
    sbud = (8 if small_vmem else 24) * 2 ** 20
    bb = min(bb, max(8, (sbud // max(per_b_stream, 1)) // 8 * 8))
    # keep >= 2 grid steps per TensorCore (v7x has 2 cores sharing the grid)
    min_steps = 4 if small_vmem else 2
    if B >= 8 * min_steps:
        bb = min(bb, max(8, ((-(-B // min_steps)) // 8) * 8))
    bb = min(bb, _round_up(B, 8))                      # never exceed the padded batch
    return bb


def location_sensitive_attention(attention_hidden_state, memory, processed_memory,
                                 attention_weights_cat, mask, params, block_b=None):
    wq, wconv, wloc, wv, r = params
    B, T, E = memory.shape
    RNN, A = wq.shape
    K, C, F_ = wconv.shape
    KC = K * C
    # TODO(synk): 'same' padding below assumes odd kernel_size (Tacotron2 default K=31).
    pad = (K - 1) // 2

    Tp = _round_up(T, 128)           # lane-dense time axis
    KCp = _round_up(KC, 16)          # bf16 sublane packing alignment

    # ---- weights (tiny, built once in XLA) -----------------------------------
    # Fuse conv taps with the location projection:
    #   Wf[a, k*C + c] = sum_f wconv[k, c, f] * wloc[f, a]
    wfT = jnp.einsum('kcf,fa->akc', wconv.astype(jnp.float32),
                     wloc.astype(jnp.float32)).reshape(A, KC)
    wfT = jnp.pad(wfT, ((0, 0), (0, KCp - KC))).astype(jnp.bfloat16)    # (A, KCp)
    wqT = jnp.asarray(wq, jnp.float32).T.astype(jnp.bfloat16)           # (A, RNN)
    wvT = jnp.asarray(wv, jnp.float32).reshape(1, A)                    # (1, A)
    r2 = jnp.asarray(r, jnp.float32).reshape(1, 1)                      # (1, 1)

    # ---- block sizing --------------------------------------------------------
    vmem_bytes = _vmem_capacity_bytes()
    per_b_stream = Tp * (2 * E + 2 * A + 2 * KCp + 4) + 2 * RNN + 4 * (E + Tp)
    per_b_scratch = 5 * A * Tp * 4            # live (A, Tp) f32 intermediates per row
    if block_b is not None:
        Bb = max(8, _round_up(int(block_b), 8))
    else:
        Bb = _choose_block_b(B, per_b_stream, per_b_scratch, vmem_bytes)
    nblk = -(-B // Bb)
    Bpad = nblk * Bb
    N = Bb * Tp
    dB, dT = Bpad - B, Tp - T

    # ---- streamed tensors ----------------------------------------------------
    mem_bf = jnp.pad(memory, ((0, dB), (0, dT), (0, 0))).astype(jnp.bfloat16)  # (Bpad,Tp,E)

    pmem = jnp.pad(processed_memory.astype(jnp.float32), ((0, dB), (0, dT), (0, 0)))
    pmemT = jnp.transpose(pmem.reshape(nblk, Bb, Tp, A), (0, 3, 1, 2)
                          ).reshape(nblk, A, N).astype(jnp.bfloat16)           # (nblk,A,N)

    # im2col of the (prev, cumulative) attention weights, time on lanes.
    awc = attention_weights_cat.astype(jnp.float32)                            # (B, 2, T)
    awc_p = jnp.pad(awc, ((0, 0), (0, 0), (pad, K - 1 - pad)))
    x2k = jnp.stack([awc_p[:, :, k:k + T] for k in range(K)], axis=1)          # (B,K,2,T)
    x2k = x2k.reshape(B, KC, T)
    x2k = jnp.pad(x2k, ((0, dB), (0, KCp - KC), (0, dT)))
    x2k = jnp.transpose(x2k.reshape(nblk, Bb, KCp, Tp), (0, 2, 1, 3)
                        ).reshape(nblk, KCp, N).astype(jnp.bfloat16)           # (nblk,KCp,N)

    # Additive mask bias: -1e30 on user-masked and T-padded steps, 0 elsewhere.
    if mask is None:
        bias_bt = jnp.zeros((B, T), jnp.float32)
    else:
        bias_bt = jnp.where(mask.reshape(B, T), jnp.float32(-1e30), jnp.float32(0.0))
    bias_bt = jnp.pad(bias_bt, ((0, 0), (0, dT)), constant_values=-1e30)
    bias_bt = jnp.pad(bias_bt, ((0, dB), (0, 0)))     # padded batch rows: harmless zeros
    bias = bias_bt.reshape(nblk, 1, N)

    # Query, transposed per block so the whole block needs one (A,RNN)@(RNN,Bb) matmul.
    q = jnp.pad(attention_hidden_state.astype(jnp.float32).reshape(B, RNN),
                ((0, dB), (0, 0)))
    qT = jnp.transpose(q.reshape(nblk, Bb, RNN), (0, 2, 1)).astype(jnp.bfloat16)

    # One-hot selector used to broadcast pq over each row's Tp time chunk.
    bid = jnp.arange(N, dtype=jnp.int32) // Tp
    sel = (bid[None, :] == jnp.arange(Bb, dtype=jnp.int32)[:, None]
           ).astype(jnp.bfloat16)                                              # (Bb, N)

    # ---- VMEM accounting -----------------------------------------------------
    stream_in = Bb * Tp * (2 * E + 2 * A + 2 * KCp + 4) + 2 * RNN * Bb
    stream_out = Bb * (E + Tp) * 4
    w_bytes = A * RNN * 2 + A * KCp * 2 + A * 4 + 4 + Bb * N * 2
    interm = 5 * A * N * 4
    vmem_need = 2 * (stream_in + stream_out) + 2 * w_bytes + interm + (4 << 20)
    vmem_limit = int(min(max(vmem_need, 16 << 20), int(0.9 * vmem_bytes)))

    ctx, attw = pl.pallas_call(
        _lsa_kernel,
        out_shape=(jax.ShapeDtypeStruct((Bpad, E), jnp.float32),
                   jax.ShapeDtypeStruct((Bpad, Tp), jnp.float32)),
        grid_spec=pltpu.PrefetchScalarGridSpec(
            num_scalar_prefetch=0,
            grid=(nblk,),
            in_specs=[
                pl.BlockSpec((1, RNN, Bb), lambda g: (g, 0, 0)),   # query^T (bf16)
                pl.BlockSpec((Bb, Tp, E), lambda g: (g, 0, 0)),    # memory (bf16)
                pl.BlockSpec((1, A, N), lambda g: (g, 0, 0)),      # processed_memory^T (bf16)
                pl.BlockSpec((1, KCp, N), lambda g: (g, 0, 0)),    # im2col att weights (bf16)
                pl.BlockSpec((1, 1, N), lambda g: (g, 0, 0)),      # additive mask/pad bias
                pl.BlockSpec((Bb, N), lambda g: (0, 0)),           # one-hot row selector
                pl.BlockSpec((A, RNN), lambda g: (0, 0)),          # Wq^T
                pl.BlockSpec((A, KCp), lambda g: (0, 0)),          # fused conv+loc weights
                pl.BlockSpec((1, A), lambda g: (0, 0)),            # v^T
                pl.BlockSpec((1, 1), lambda g: (0, 0)),            # r
            ],
            out_specs=(pl.BlockSpec((Bb, E), lambda g: (g, 0)),    # dense 2-D contexts
                       pl.BlockSpec((Bb, Tp), lambda g: (g, 0))),  # dense 2-D attn weights
        ),
        compiler_params=pltpu.CompilerParams(
            dimension_semantics=("parallel",),
            vmem_limit_bytes=vmem_limit),
    )(qT, mem_bf, pmemT, x2k, bias, sel, wqT, wfT, wvT, r2)

    return ctx[:B], attw[:B, :T]


def reference(q, memory, pmem, awc_nct, mask, params):
    """Pure-JAX re-implementation of the PyTorch forward for validation."""
    wq, wconv_k2f, wloc, wv, r = params
    proc_q = (q @ wq)[:, None, :]                                    # (B, 1, A)
    w_oih = jnp.transpose(wconv_k2f, (2, 1, 0))                      # (F, 2, K)
    pad = (wconv_k2f.shape[0] - 1) // 2
    conv = jax.lax.conv_general_dilated(
        awc_nct, w_oih, window_strides=(1,), padding=[(pad, pad)],
        dimension_numbers=('NCH', 'OIH', 'NCH'))                     # (B, F, T)
    proc_attn = jnp.einsum('bft,fa->bta', conv, wloc)                # (B, T, A)
    energies = jnp.einsum('bta,ao->bt',
                          jnp.tanh(proc_q + proc_attn + pmem), wv) + r
    energies = jnp.where(mask, -1e20, energies)
    attw = jax.nn.softmax(energies, axis=1)
    ctx = jnp.einsum('bt,bte->be', attw, memory)
    return ctx, attw


if __name__ == "__main__":
    key = jax.random.PRNGKey(0)
    B, T = 2, 16
    RNN, E, A, F_, K = 32, 32, 32, 4, 5

    ks = jax.random.split(key, 8)
    q = jax.random.normal(ks[0], (B, RNN), jnp.float32)
    memory = jax.random.normal(ks[1], (B, T, E), jnp.float32)
    # processed_memory is a direct input to forward(); generate it directly.
    pmem = 0.5 * jax.random.normal(ks[2], (B, T, A), jnp.float32)
    awc = jax.nn.softmax(jax.random.normal(ks[3], (B, 2, T), jnp.float32), axis=-1)
    lengths = jnp.array([T, T - 5])
    mask = jnp.arange(T)[None, :] >= lengths[:, None]                # True == padded

    scale = 0.1
    wq = scale * jax.random.normal(ks[4], (RNN, A), jnp.float32)     # query proj (in-major)
    wconv = scale * jax.random.normal(ks[5], (K, 2, F_), jnp.float32)  # conv taps (K, C, F)
    wloc = scale * jax.random.normal(ks[6], (F_, A), jnp.float32)    # location proj
    wv = scale * jax.random.normal(ks[7], (A, 1), jnp.float32)       # v
    r = jnp.float32(-4.0)                                            # init_r
    params = (wq, wconv, wloc, wv, r)

    ctx, attw = location_sensitive_attention(q, memory, pmem, awc, mask, params)
    jax.block_until_ready((ctx, attw))

    # Reference consumes the same bf16-rounded streamed tensors (and bf16-rounded
    # query) the kernel streams, isolating kernel math from the intentional
    # bf16 HBM-traffic cut.
    rnd = lambda x: x.astype(jnp.bfloat16).astype(jnp.float32)
    ctx_ref, attw_ref = reference(rnd(q), rnd(memory), rnd(pmem), rnd(awc), mask, params)

    assert ctx.shape == (B, E) and attw.shape == (B, T)
    assert bool(jnp.all(jnp.isfinite(ctx))) and bool(jnp.all(jnp.isfinite(attw)))
    assert jnp.allclose(attw, attw_ref, atol=1e-2, rtol=1e-2), \
        float(jnp.max(jnp.abs(attw - attw_ref)))
    assert jnp.allclose(ctx, ctx_ref, atol=2e-2, rtol=2e-2), \
        float(jnp.max(jnp.abs(ctx - ctx_ref)))
    print("KERNEL_OK")
</pallas_src>

<mosaic_0001>
module attributes {stable_mosaic.version = 11 : i64} {
  func.func @_lsa_kernel(%arg0: i32, %arg1: memref<1x32x8xbf16, #tpu.memory_space<vmem>>, %arg2: memref<8x128x32xbf16, #tpu.memory_space<vmem>>, %arg3: memref<1x32x1024xbf16, #tpu.memory_space<vmem>>, %arg4: memref<1x16x1024xbf16, #tpu.memory_space<vmem>>, %arg5: memref<1x1x1024xf32, #tpu.memory_space<vmem>>, %arg6: memref<8x1024xbf16, #tpu.memory_space<vmem>>, %arg7: memref<32x32xbf16, #tpu.memory_space<vmem>>, %arg8: memref<32x16xbf16, #tpu.memory_space<vmem>>, %arg9: memref<1x32xf32, #tpu.memory_space<vmem>>, %arg10: memref<1x1xf32, #tpu.memory_space<vmem>>, %arg11: memref<8x32xf32, #tpu.memory_space<vmem>>, %arg12: memref<8x128xf32, #tpu.memory_space<vmem>>) attributes {dimension_semantics = [#tpu.dimension_semantics<parallel>], iteration_bounds = array<i64: 1>, scalar_prefetch = 0 : i64, scratch_operands = 0 : i64, tpu.core_type = #tpu.core_type<tc>, window_params = [{transform_indices = @transform_0, window_bounds = array<i64: 1, 32, 8>}, {transform_indices = @transform_1, window_bounds = array<i64: 8, 128, 32>}, {transform_indices = @transform_2, window_bounds = array<i64: 1, 32, 1024>}, {transform_indices = @transform_3, window_bounds = array<i64: 1, 16, 1024>}, {transform_indices = @transform_4, window_bounds = array<i64: 1, 1, 1024>}, {pipeline_mode = #tpu.pipeline_mode<synchronous>, transform_indices = @transform_5, window_bounds = array<i64: 8, 1024>}, {pipeline_mode = #tpu.pipeline_mode<synchronous>, transform_indices = @transform_6, window_bounds = array<i64: 32, 32>}, {pipeline_mode = #tpu.pipeline_mode<synchronous>, transform_indices = @transform_7, window_bounds = array<i64: 32, 16>}, {pipeline_mode = #tpu.pipeline_mode<synchronous>, transform_indices = @transform_8, window_bounds = array<i64: 1, 32>}, {pipeline_mode = #tpu.pipeline_mode<synchronous>, transform_indices = @transform_9, window_bounds = array<i64: 1, 1>}, {transform_indices = @transform_10, window_bounds = array<i64: 8, 32>}, {transform_indices = @transform_11, window_bounds = array<i64: 8, 128>}]} {
    %c0 = arith.constant 0 : index
    %c0_0 = arith.constant 0 : index
    %0 = vector.load %arg7[%c0, %c0_0] : memref<32x32xbf16, #tpu.memory_space<vmem>>, vector<32x32xbf16>
    %c0_1 = arith.constant 0 : index
    %c0_2 = arith.constant 0 : index
    %c0_3 = arith.constant 0 : index
    %1 = vector.load %arg1[%c0_1, %c0_2, %c0_3] : memref<1x32x8xbf16, #tpu.memory_space<vmem>>, vector<1x32x8xbf16>
    %2 = vector.shape_cast %1 : vector<1x32x8xbf16> to vector<32x8xbf16>
    %cst = arith.constant dense<0.000000e+00> : vector<32x8xf32>
    %3 = tpu.matmul %0, %2, %cst {dimension_numbers = #tpu.dot_dimension_numbers<[1], [0], [0], [1], [0, 0, 1, 1], [], []>} : vector<32x32xbf16>, vector<32x8xbf16>, vector<32x8xf32> -> vector<32x8xf32>
    %4 = arith.truncf %3 : vector<32x8xf32> to vector<32x8xbf16>
    %c0_4 = arith.constant 0 : index
    %c0_5 = arith.constant 0 : index
    %5 = vector.load %arg6[%c0_4, %c0_5] : memref<8x1024xbf16, #tpu.memory_space<vmem>>, vector<8x1024xbf16>
    %cst_6 = arith.constant dense<0.000000e+00> : vector<32x1024xf32>
    %6 = tpu.matmul %4, %5, %cst_6 {dimension_numbers = #tpu.dot_dimension_numbers<[1], [0], [0], [1], [0, 0, 1, 1], [], []>} : vector<32x8xbf16>, vector<8x1024xbf16>, vector<32x1024xf32> -> vector<32x1024xf32>
    %c0_7 = arith.constant 0 : index
    %c0_8 = arith.constant 0 : index
    %7 = vector.load %arg8[%c0_7, %c0_8] : memref<32x16xbf16, #tpu.memory_space<vmem>>, vector<32x16xbf16>
    %c0_9 = arith.constant 0 : index
    %c0_10 = arith.constant 0 : index
    %c0_11 = arith.constant 0 : index
    %8 = vector.load %arg4[%c0_9, %c0_10, %c0_11] : memref<1x16x1024xbf16, #tpu.memory_space<vmem>>, vector<1x16x1024xbf16>
    %9 = vector.shape_cast %8 : vector<1x16x1024xbf16> to vector<16x1024xbf16>
    %cst_12 = arith.constant dense<0.000000e+00> : vector<32x1024xf32>
    %10 = tpu.matmul %7, %9, %cst_12 {dimension_numbers = #tpu.dot_dimension_numbers<[1], [0], [0], [1], [0, 0, 1, 1], [], []>} : vector<32x16xbf16>, vector<16x1024xbf16>, vector<32x1024xf32> -> vector<32x1024xf32>
    %11 = arith.addf %10, %6 : vector<32x1024xf32>
    %c0_13 = arith.constant 0 : index
    %c0_14 = arith.constant 0 : index
    %c0_15 = arith.constant 0 : index
    %12 = vector.load %arg3[%c0_13, %c0_14, %c0_15] : memref<1x32x1024xbf16, #tpu.memory_space<vmem>>, vector<1x32x1024xbf16>
    %13 = vector.shape_cast %12 : vector<1x32x1024xbf16> to vector<32x1024xbf16>
    %14 = arith.extf %13 : vector<32x1024xbf16> to vector<32x1024xf32>
    %15 = arith.addf %11, %14 : vector<32x1024xf32>
    %16 = math.tanh %15 : vector<32x1024xf32>
    %c0_16 = arith.constant 0 : index
    %c0_17 = arith.constant 0 : index
    %17 = vector.load %arg9[%c0_16, %c0_17] : memref<1x32xf32, #tpu.memory_space<vmem>>, vector<1x32xf32>
    %cst_18 = arith.constant dense<0.000000e+00> : vector<1x1024xf32>
    %18 = tpu.matmul %17, %16, %cst_18 {dimension_numbers = #tpu.dot_dimension_numbers<[1], [0], [0], [1], [0, 0, 1, 1], [], []>} : vector<1x32xf32>, vector<32x1024xf32>, vector<1x1024xf32> -> vector<1x1024xf32>
    %c0_19 = arith.constant 0 : index
    %c0_20 = arith.constant 0 : index
    %19 = vector.load %arg10[%c0_19, %c0_20] : memref<1x1xf32, #tpu.memory_space<vmem>>, vector<1x1xf32>
    %20 = vector.broadcast %19 : vector<1x1xf32> to vector<1x1024xf32>
    %21 = arith.addf %18, %20 : vector<1x1024xf32>
    %c0_21 = arith.constant 0 : index
    %c0_22 = arith.constant 0 : index
    %c0_23 = arith.constant 0 : index
    %22 = vector.load %arg5[%c0_21, %c0_22, %c0_23] : memref<1x1x1024xf32, #tpu.memory_space<vmem>>, vector<1x1x1024xf32>
    %23 = vector.shape_cast %22 : vector<1x1x1024xf32> to vector<1x1024xf32>
    %24 = arith.addf %21, %23 : vector<1x1024xf32>
    %25 = vector.extract_strided_slice %24 {offsets = [0, 0], sizes = [1, 128], strides = [1, 1]} : vector<1x1024xf32> to vector<1x128xf32>
    %cst_24 = arith.constant dense<0xFF800000> : vector<1xf32>
    %26 = vector.multi_reduction <maximumf>, %25, %cst_24 [1] : vector<1x128xf32> to vector<1xf32>
    %27 = vector.shape_cast %26 : vector<1xf32> to vector<1x1xf32>
    %28 = vector.broadcast %27 : vector<1x1xf32> to vector<1x128xf32>
    %29 = arith.subf %25, %28 : vector<1x128xf32>
    %30 = math.exp %29 : vector<1x128xf32>
    %cst_25 = arith.constant dense<0.000000e+00> : vector<1xf32>
    %31 = vector.multi_reduction <add>, %30, %cst_25 [1] : vector<1x128xf32> to vector<1xf32>
    %32 = vector.shape_cast %31 : vector<1xf32> to vector<1x1xf32>
    %33 = vector.broadcast %32 : vector<1x1xf32> to vector<1x128xf32>
    %34 = arith.divf %30, %33 : vector<1x128xf32>
    %35 = arith.truncf %34 : vector<1x128xf32> to vector<1x128xbf16>
    %c0_26 = arith.constant 0 : index
    %c0_27 = arith.constant 0 : index
    %c0_28 = arith.constant 0 : index
    %36 = vector.load %arg2[%c0_26, %c0_27, %c0_28] : memref<8x128x32xbf16, #tpu.memory_space<vmem>>, vector<1x128x32xbf16>
    %37 = vector.shape_cast %36 : vector<1x128x32xbf16> to vector<128x32xbf16>
    %cst_29 = arith.constant dense<0.000000e+00> : vector<1x32xf32>
    %38 = tpu.matmul %35, %37, %cst_29 {dimension_numbers = #tpu.dot_dimension_numbers<[1], [0], [0], [1], [0, 0, 1, 1], [], []>} : vector<1x128xbf16>, vector<128x32xbf16>, vector<1x32xf32> -> vector<1x32xf32>
    %c0_30 = arith.constant 0 : index
    %c0_31 = arith.constant 0 : index
    %39 = vector.load %arg12[%c0_30, %c0_31] : memref<8x128xf32, #tpu.memory_space<vmem>>, vector<1x128xf32>
    tpu.vector_store %arg12[%c0_30, %c0_31], %34 {strides = array<i32>} : memref<8x128xf32, #tpu.memory_space<vmem>>, vector<1x128xf32>,
    %c0_32 = arith.constant 0 : index
    %c0_33 = arith.constant 0 : index
    %40 = vector.load %arg11[%c0_32, %c0_33] : memref<8x32xf32, #tpu.memory_space<vmem>>, vector<1x32xf32>
    tpu.vector_store %arg11[%c0_32, %c0_33], %38 {strides = array<i32>} : memref<8x32xf32, #tpu.memory_space<vmem>>, vector<1x32xf32>,
    %41 = vector.extract_strided_slice %24 {offsets = [0, 128], sizes = [1, 128], strides = [1, 1]} : vector<1x1024xf32> to vector<1x128xf32>
    %cst_34 = arith.constant dense<0xFF800000> : vector<1xf32>
    %42 = vector.multi_reduction <maximumf>, %41, %cst_34 [1] : vector<1x128xf32> to vector<1xf32>
    %43 = vector.shape_cast %42 : vector<1xf32> to vector<1x1xf32>
    %44 = vector.broadcast %43 : vector<1x1xf32> to vector<1x128xf32>
    %45 = arith.subf %41, %44 : vector<1x128xf32>
    %46 = math.exp %45 : vector<1x128xf32>
    %cst_35 = arith.constant dense<0.000000e+00> : vector<1xf32>
    %47 = vector.multi_reduction <add>, %46, %cst_35 [1] : vector<1x128xf32> to vector<1xf32>
    %48 = vector.shape_cast %47 : vector<1xf32> to vector<1x1xf32>
    %49 = vector.broadcast %48 : vector<1x1xf32> to vector<1x128xf32>
    %50 = arith.divf %46, %49 : vector<1x128xf32>
    %51 = arith.truncf %50 : vector<1x128xf32> to vector<1x128xbf16>
    %c1 = arith.constant 1 : index
    %c0_36 = arith.constant 0 : index
    %c0_37 = arith.constant 0 : index
    %52 = vector.load %arg2[%c1, %c0_36, %c0_37] : memref<8x128x32xbf16, #tpu.memory_space<vmem>>, vector<1x128x32xbf16>
    %53 = vector.shape_cast %52 : vector<1x128x32xbf16> to vector<128x32xbf16>
    %cst_38 = arith.constant dense<0.000000e+00> : vector<1x32xf32>
    %54 = tpu.matmul %51, %53, %cst_38 {dimension_numbers = #tpu.dot_dimension_numbers<[1], [0], [0], [1], [0, 0, 1, 1], [], []>} : vector<1x128xbf16>, vector<128x32xbf16>, vector<1x32xf32> -> vector<1x32xf32>
    %c1_39 = arith.constant 1 : index
    %c0_40 = arith.constant 0 : index
    %55 = vector.load %arg12[%c1_39, %c0_40] : memref<8x128xf32, #tpu.memory_space<vmem>>, vector<1x128xf32>
    tpu.vector_store %arg12[%c1_39, %c0_40], %50 {strides = array<i32>} : memref<8x128xf32, #tpu.memory_space<vmem>>, vector<1x128xf32>,
    %c1_41 = arith.constant 1 : index
    %c0_42 = arith.constant 0 : index
    %56 = vector.load %arg11[%c1_41, %c0_42] : memref<8x32xf32, #tpu.memory_space<vmem>>, vector<1x32xf32>
    tpu.vector_store %arg11[%c1_41, %c0_42], %54 {strides = array<i32>} : memref<8x32xf32, #tpu.memory_space<vmem>>, vector<1x32xf32>,
    %57 = vector.extract_strided_slice %24 {offsets = [0, 256], sizes = [1, 128], strides = [1, 1]} : vector<1x1024xf32> to vector<1x128xf32>
    %cst_43 = arith.constant dense<0xFF800000> : vector<1xf32>
    %58 = vector.multi_reduction <maximumf>, %57, %cst_43 [1] : vector<1x128xf32> to vector<1xf32>
    %59 = vector.shape_cast %58 : vector<1xf32> to vector<1x1xf32>
    %60 = vector.broadcast %59 : vector<1x1xf32> to vector<1x128xf32>
    %61 = arith.subf %57, %60 : vector<1x128xf32>
    %62 = math.exp %61 : vector<1x128xf32>
    %cst_44 = arith.constant dense<0.000000e+00> : vector<1xf32>
    %63 = vector.multi_reduction <add>, %62, %cst_44 [1] : vector<1x128xf32> to vector<1xf32>
    %64 = vector.shape_cast %63 : vector<1xf32> to vector<1x1xf32>
    %65 = vector.broadcast %64 : vector<1x1xf32> to vector<1x128xf32>
    %66 = arith.divf %62, %65 : vector<1x128xf32>
    %67 = arith.truncf %66 : vector<1x128xf32> to vector<1x128xbf16>
    %c2 = arith.constant 2 : index
    %c0_45 = arith.constant 0 : index
    %c0_46 = arith.constant 0 : index
    %68 = vector.load %arg2[%c2, %c0_45, %c0_46] : memref<8x128x32xbf16, #tpu.memory_space<vmem>>, vector<1x128x32xbf16>
    %69 = vector.shape_cast %68 : vector<1x128x32xbf16> to vector<128x32xbf16>
    %cst_47 = arith.constant dense<0.000000e+00> : vector<1x32xf32>
    %70 = tpu.matmul %67, %69, %cst_47 {dimension_numbers = #tpu.dot_dimension_numbers<[1], [0], [0], [1], [0, 0, 1, 1], [], []>} : vector<1x128xbf16>, vector<128x32xbf16>, vector<1x32xf32> -> vector<1x32xf32>
    %c2_48 = arith.constant 2 : index
    %c0_49 = arith.constant 0 : index
    %71 = vector.load %arg12[%c2_48, %c0_49] : memref<8x128xf32, #tpu.memory_space<vmem>>, vector<1x128xf32>
    tpu.vector_store %arg12[%c2_48, %c0_49], %66 {strides = array<i32>} : memref<8x128xf32, #tpu.memory_space<vmem>>, vector<1x128xf32>,
    %c2_50 = arith.constant 2 : index
    %c0_51 = arith.constant 0 : index
    %72 = vector.load %arg11[%c2_50, %c0_51] : memref<8x32xf32, #tpu.memory_space<vmem>>, vector<1x32xf32>
    tpu.vector_store %arg11[%c2_50, %c0_51], %70 {strides = array<i32>} : memref<8x32xf32, #tpu.memory_space<vmem>>, vector<1x32xf32>,
    %73 = vector.extract_strided_slice %24 {offsets = [0, 384], sizes = [1, 128], strides = [1, 1]} : vector<1x1024xf32> to vector<1x128xf32>
    %cst_52 = arith.constant dense<0xFF800000> : vector<1xf32>
    %74 = vector.multi_reduction <maximumf>, %73, %cst_52 [1] : vector<1x128xf32> to vector<1xf32>
    %75 = vector.shape_cast %74 : vector<1xf32> to vector<1x1xf32>
    %76 = vector.broadcast %75 : vector<1x1xf32> to vector<1x128xf32>
    %77 = arith.subf %73, %76 : vector<1x128xf32>
    %78 = math.exp %77 : vector<1x128xf32>
    %cst_53 = arith.constant dense<0.000000e+00> : vector<1xf32>
    %79 = vector.multi_reduction <add>, %78, %cst_53 [1] : vector<1x128xf32> to vector<1xf32>
    %80 = vector.shape_cast %79 : vector<1xf32> to vector<1x1xf32>
    %81 = vector.broadcast %80 : vector<1x1xf32> to vector<1x128xf32>
    %82 = arith.divf %78, %81 : vector<1x128xf32>
    %83 = arith.truncf %82 : vector<1x128xf32> to vector<1x128xbf16>
    %c3 = arith.constant 3 : index
    %c0_54 = arith.constant 0 : index
    %c0_55 = arith.constant 0 : index
    %84 = vector.load %arg2[%c3, %c0_54, %c0_55] : memref<8x128x32xbf16, #tpu.memory_space<vmem>>, vector<1x128x32xbf16>
    %85 = vector.shape_cast %84 : vector<1x128x32xbf16> to vector<128x32xbf16>
    %cst_56 = arith.constant dense<0.000000e+00> : vector<1x32xf32>
    %86 = tpu.matmul %83, %85, %cst_56 {dimension_numbers = #tpu.dot_dimension_numbers<[1], [0], [0], [1], [0, 0, 1, 1], [], []>} : vector<1x128xbf16>, vector<128x32xbf16>, vector<1x32xf32> -> vector<1x32xf32>
    %c3_57 = arith.constant 3 : index
    %c0_58 = arith.constant 0 : index
    %87 = vector.load %arg12[%c3_57, %c0_58] : memref<8x128xf32, #tpu.memory_space<vmem>>, vector<1x128xf32>
    tpu.vector_store %arg12[%c3_57, %c0_58], %82 {strides = array<i32>} : memref<8x128xf32, #tpu.memory_space<vmem>>, vector<1x128xf32>,
    %c3_59 = arith.constant 3 : index
    %c0_60 = arith.constant 0 : index
    %88 = vector.load %arg11[%c3_59, %c0_60] : memref<8x32xf32, #tpu.memory_space<vmem>>, vector<1x32xf32>
    tpu.vector_store %arg11[%c3_59, %c0_60], %86 {strides = array<i32>} : memref<8x32xf32, #tpu.memory_space<vmem>>, vector<1x32xf32>,
    %89 = vector.extract_strided_slice %24 {offsets = [0, 512], sizes = [1, 128], strides = [1, 1]} : vector<1x1024xf32> to vector<1x128xf32>
    %cst_61 = arith.constant dense<0xFF800000> : vector<1xf32>
    %90 = vector.multi_reduction <maximumf>, %89, %cst_61 [1] : vector<1x128xf32> to vector<1xf32>
    %91 = vector.shape_cast %90 : vector<1xf32> to vector<1x1xf32>
    %92 = vector.broadcast %91 : vector<1x1xf32> to vector<1x128xf32>
    %93 = arith.subf %89, %92 : vector<1x128xf32>
    %94 = math.exp %93 : vector<1x128xf32>
    %cst_62 = arith.constant dense<0.000000e+00> : vector<1xf32>
    %95 = vector.multi_reduction <add>, %94, %cst_62 [1] : vector<1x128xf32> to vector<1xf32>
    %96 = vector.shape_cast %95 : vector<1xf32> to vector<1x1xf32>
    %97 = vector.broadcast %96 : vector<1x1xf32> to vector<1x128xf32>
    %98 = arith.divf %94, %97 : vector<1x128xf32>
    %99 = arith.truncf %98 : vector<1x128xf32> to vector<1x128xbf16>
    %c4 = arith.constant 4 : index
    %c0_63 = arith.constant 0 : index
    %c0_64 = arith.constant 0 : index
    %100 = vector.load %arg2[%c4, %c0_63, %c0_64] : memref<8x128x32xbf16, #tpu.memory_space<vmem>>, vector<1x128x32xbf16>
    %101 = vector.shape_cast %100 : vector<1x128x32xbf16> to vector<128x32xbf16>
    %cst_65 = arith.constant dense<0.000000e+00> : vector<1x32xf32>
    %102 = tpu.matmul %99, %101, %cst_65 {dimension_numbers = #tpu.dot_dimension_numbers<[1], [0], [0], [1], [0, 0, 1, 1], [], []>} : vector<1x128xbf16>, vector<128x32xbf16>, vector<1x32xf32> -> vector<1x32xf32>
    %c4_66 = arith.constant 4 : index
    %c0_67 = arith.constant 0 : index
    %103 = vector.load %arg12[%c4_66, %c0_67] : memref<8x128xf32, #tpu.memory_space<vmem>>, vector<1x128xf32>
    tpu.vector_store %arg12[%c4_66, %c0_67], %98 {strides = array<i32>} : memref<8x128xf32, #tpu.memory_space<vmem>>, vector<1x128xf32>,
    %c4_68 = arith.constant 4 : index
    %c0_69 = arith.constant 0 : index
    %104 = vector.load %arg11[%c4_68, %c0_69] : memref<8x32xf32, #tpu.memory_space<vmem>>, vector<1x32xf32>
    tpu.vector_store %arg11[%c4_68, %c0_69], %102 {strides = array<i32>} : memref<8x32xf32, #tpu.memory_space<vmem>>, vector<1x32xf32>,
    %105 = vector.extract_strided_slice %24 {offsets = [0, 640], sizes = [1, 128], strides = [1, 1]} : vector<1x1024xf32> to vector<1x128xf32>
    %cst_70 = arith.constant dense<0xFF800000> : vector<1xf32>
    %106 = vector.multi_reduction <maximumf>, %105, %cst_70 [1] : vector<1x128xf32> to vector<1xf32>
    %107 = vector.shape_cast %106 : vector<1xf32> to vector<1x1xf32>
    %108 = vector.broadcast %107 : vector<1x1xf32> to vector<1x128xf32>
    %109 = arith.subf %105, %108 : vector<1x128xf32>
    %110 = math.exp %109 : vector<1x128xf32>
    %cst_71 = arith.constant dense<0.000000e+00> : vector<1xf32>
    %111 = vector.multi_reduction <add>, %110, %cst_71 [1] : vector<1x128xf32> to vector<1xf32>
    %112 = vector.shape_cast %111 : vector<1xf32> to vector<1x1xf32>
    %113 = vector.broadcast %112 : vector<1x1xf32> to vector<1x128xf32>
    %114 = arith.divf %110, %113 : vector<1x128xf32>
    %115 = arith.truncf %114 : vector<1x128xf32> to vector<1x128xbf16>
    %c5 = arith.constant 5 : index
    %c0_72 = arith.constant 0 : index
    %c0_73 = arith.constant 0 : index
    %116 = vector.load %arg2[%c5, %c0_72, %c0_73] : memref<8x128x32xbf16, #tpu.memory_space<vmem>>, vector<1x128x32xbf16>
    %117 = vector.shape_cast %116 : vector<1x128x32xbf16> to vector<128x32xbf16>
    %cst_74 = arith.constant dense<0.000000e+00> : vector<1x32xf32>
    %118 = tpu.matmul %115, %117, %cst_74 {dimension_numbers = #tpu.dot_dimension_numbers<[1], [0], [0], [1], [0, 0, 1, 1], [], []>} : vector<1x128xbf16>, vector<128x32xbf16>, vector<1x32xf32> -> vector<1x32xf32>
    %c5_75 = arith.constant 5 : index
    %c0_76 = arith.constant 0 : index
    %119 = vector.load %arg12[%c5_75, %c0_76] : memref<8x128xf32, #tpu.memory_space<vmem>>, vector<1x128xf32>
    tpu.vector_store %arg12[%c5_75, %c0_76], %114 {strides = array<i32>} : memref<8x128xf32, #tpu.memory_space<vmem>>, vector<1x128xf32>,
    %c5_77 = arith.constant 5 : index
    %c0_78 = arith.constant 0 : index
    %120 = vector.load %arg11[%c5_77, %c0_78] : memref<8x32xf32, #tpu.memory_space<vmem>>, vector<1x32xf32>
    tpu.vector_store %arg11[%c5_77, %c0_78], %118 {strides = array<i32>} : memref<8x32xf32, #tpu.memory_space<vmem>>, vector<1x32xf32>,
    %121 = vector.extract_strided_slice %24 {offsets = [0, 768], sizes = [1, 128], strides = [1, 1]} : vector<1x1024xf32> to vector<1x128xf32>
    %cst_79 = arith.constant dense<0xFF800000> : vector<1xf32>
    %122 = vector.multi_reduction <maximumf>, %121, %cst_79 [1] : vector<1x128xf32> to vector<1xf32>
    %123 = vector.shape_cast %122 : vector<1xf32> to vector<1x1xf32>
    %124 = vector.broadcast %123 : vector<1x1xf32> to vector<1x128xf32>
    %125 = arith.subf %121, %124 : vector<1x128xf32>
    %126 = math.exp %125 : vector<1x128xf32>
    %cst_80 = arith.constant dense<0.000000e+00> : vector<1xf32>
    %127 = vector.multi_reduction <add>, %126, %cst_80 [1] : vector<1x128xf32> to vector<1xf32>
    %128 = vector.shape_cast %127 : vector<1xf32> to vector<1x1xf32>
    %129 = vector.broadcast %128 : vector<1x1xf32> to vector<1x128xf32>
    %130 = arith.divf %126, %129 : vector<1x128xf32>
    %131 = arith.truncf %130 : vector<1x128xf32> to vector<1x128xbf16>
    %c6 = arith.constant 6 : index
    %c0_81 = arith.constant 0 : index
    %c0_82 = arith.constant 0 : index
    %132 = vector.load %arg2[%c6, %c0_81, %c0_82] : memref<8x128x32xbf16, #tpu.memory_space<vmem>>, vector<1x128x32xbf16>
    %133 = vector.shape_cast %132 : vector<1x128x32xbf16> to vector<128x32xbf16>
    %cst_83 = arith.constant dense<0.000000e+00> : vector<1x32xf32>
    %134 = tpu.matmul %131, %133, %cst_83 {dimension_numbers = #tpu.dot_dimension_numbers<[1], [0], [0], [1], [0, 0, 1, 1], [], []>} : vector<1x128xbf16>, vector<128x32xbf16>, vector<1x32xf32> -> vector<1x32xf32>
    %c6_84 = arith.constant 6 : index
    %c0_85 = arith.constant 0 : index
    %135 = vector.load %arg12[%c6_84, %c0_85] : memref<8x128xf32, #tpu.memory_space<vmem>>, vector<1x128xf32>
    tpu.vector_store %arg12[%c6_84, %c0_85], %130 {strides = array<i32>} : memref<8x128xf32, #tpu.memory_space<vmem>>, vector<1x128xf32>,
    %c6_86 = arith.constant 6 : index
    %c0_87 = arith.constant 0 : index
    %136 = vector.load %arg11[%c6_86, %c0_87] : memref<8x32xf32, #tpu.memory_space<vmem>>, vector<1x32xf32>
    tpu.vector_store %arg11[%c6_86, %c0_87], %134 {strides = array<i32>} : memref<8x32xf32, #tpu.memory_space<vmem>>, vector<1x32xf32>,
    %137 = vector.extract_strided_slice %24 {offsets = [0, 896], sizes = [1, 128], strides = [1, 1]} : vector<1x1024xf32> to vector<1x128xf32>
    %cst_88 = arith.constant dense<0xFF800000> : vector<1xf32>
    %138 = vector.multi_reduction <maximumf>, %137, %cst_88 [1] : vector<1x128xf32> to vector<1xf32>
    %139 = vector.shape_cast %138 : vector<1xf32> to vector<1x1xf32>
    %140 = vector.broadcast %139 : vector<1x1xf32> to vector<1x128xf32>
    %141 = arith.subf %137, %140 : vector<1x128xf32>
    %142 = math.exp %141 : vector<1x128xf32>
    %cst_89 = arith.constant dense<0.000000e+00> : vector<1xf32>
    %143 = vector.multi_reduction <add>, %142, %cst_89 [1] : vector<1x128xf32> to vector<1xf32>
    %144 = vector.shape_cast %143 : vector<1xf32> to vector<1x1xf32>
    %145 = vector.broadcast %144 : vector<1x1xf32> to vector<1x128xf32>
    %146 = arith.divf %142, %145 : vector<1x128xf32>
    %147 = arith.truncf %146 : vector<1x128xf32> to vector<1x128xbf16>
    %c7 = arith.constant 7 : index
    %c0_90 = arith.constant 0 : index
    %c0_91 = arith.constant 0 : index
    %148 = vector.load %arg2[%c7, %c0_90, %c0_91] : memref<8x128x32xbf16, #tpu.memory_space<vmem>>, vector<1x128x32xbf16>
    %149 = vector.shape_cast %148 : vector<1x128x32xbf16> to vector<128x32xbf16>
    %cst_92 = arith.constant dense<0.000000e+00> : vector<1x32xf32>
    %150 = tpu.matmul %147, %149, %cst_92 {dimension_numbers = #tpu.dot_dimension_numbers<[1], [0], [0], [1], [0, 0, 1, 1], [], []>} : vector<1x128xbf16>, vector<128x32xbf16>, vector<1x32xf32> -> vector<1x32xf32>
    %c7_93 = arith.constant 7 : index
    %c0_94 = arith.constant 0 : index
    %151 = vector.load %arg12[%c7_93, %c0_94] : memref<8x128xf32, #tpu.memory_space<vmem>>, vector<1x128xf32>
    tpu.vector_store %arg12[%c7_93, %c0_94], %146 {strides = array<i32>} : memref<8x128xf32, #tpu.memory_space<vmem>>, vector<1x128xf32>,
    %c7_95 = arith.constant 7 : index
    %c0_96 = arith.constant 0 : index
    %152 = vector.load %arg11[%c7_95, %c0_96] : memref<8x32xf32, #tpu.memory_space<vmem>>, vector<1x32xf32>
    tpu.vector_store %arg11[%c7_95, %c0_96], %150 {strides = array<i32>} : memref<8x32xf32, #tpu.memory_space<vmem>>, vector<1x32xf32>,
    return
  }
  func.func @transform_0(%arg0: i32) -> (i32, i32, i32) {
    %c0_i32 = arith.constant 0 : i32
    %c0_i32_0 = arith.constant 0 : i32
    %c0_i32_1 = arith.constant 0 : i32
    return %arg0, %c0_i32, %c0_i32_0 : i32, i32, i32
  }
  func.func @transform_1(%arg0: i32) -> (i32, i32, i32) {
    %c0_i32 = arith.constant 0 : i32
    %c0_i32_0 = arith.constant 0 : i32
    %c0_i32_1 = arith.constant 0 : i32
    return %arg0, %c0_i32, %c0_i32_0 : i32, i32, i32
  }
  func.func @transform_2(%arg0: i32) -> (i32, i32, i32) {
    %c0_i32 = arith.constant 0 : i32
    %c0_i32_0 = arith.constant 0 : i32
    %c0_i32_1 = arith.constant 0 : i32
    return %arg0, %c0_i32, %c0_i32_0 : i32, i32, i32
  }
  func.func @transform_3(%arg0: i32) -> (i32, i32, i32) {
    %c0_i32 = arith.constant 0 : i32
    %c0_i32_0 = arith.constant 0 : i32
    %c0_i32_1 = arith.constant 0 : i32
    return %arg0, %c0_i32, %c0_i32_0 : i32, i32, i32
  }
  func.func @transform_4(%arg0: i32) -> (i32, i32, i32) {
    %c0_i32 = arith.constant 0 : i32
    %c0_i32_0 = arith.constant 0 : i32
    %c0_i32_1 = arith.constant 0 : i32
    return %arg0, %c0_i32, %c0_i32_0 : i32, i32, i32
  }
  func.func @transform_5(%arg0: i32) -> (i32, i32) {
    %c0_i32 = arith.constant 0 : i32
    %c0_i32_0 = arith.constant 0 : i32
    %c0_i32_1 = arith.constant 0 : i32
    return %c0_i32, %c0_i32_0 : i32, i32
  }
  func.func @transform_6(%arg0: i32) -> (i32, i32) {
    %c0_i32 = arith.constant 0 : i32
    %c0_i32_0 = arith.constant 0 : i32
    %c0_i32_1 = arith.constant 0 : i32
    return %c0_i32, %c0_i32_0 : i32, i32
  }
  func.func @transform_7(%arg0: i32) -> (i32, i32) {
    %c0_i32 = arith.constant 0 : i32
    %c0_i32_0 = arith.constant 0 : i32
    %c0_i32_1 = arith.constant 0 : i32
    return %c0_i32, %c0_i32_0 : i32, i32
  }
  func.func @transform_8(%arg0: i32) -> (i32, i32) {
    %c0_i32 = arith.constant 0 : i32
    %c0_i32_0 = arith.constant 0 : i32
    %c0_i32_1 = arith.constant 0 : i32
    return %c0_i32, %c0_i32_0 : i32, i32
  }
  func.func @transform_9(%arg0: i32) -> (i32, i32) {
    %c0_i32 = arith.constant 0 : i32
    %c0_i32_0 = arith.constant 0 : i32
    %c0_i32_1 = arith.constant 0 : i32
    return %c0_i32, %c0_i32_0 : i32, i32
  }
  func.func @transform_10(%arg0: i32) -> (i32, i32) {
    %c0_i32 = arith.constant 0 : i32
    %c0_i32_0 = arith.constant 0 : i32
    return %arg0, %c0_i32 : i32, i32
  }
  func.func @transform_11(%arg0: i32) -> (i32, i32) {
    %c0_i32 = arith.constant 0 : i32
    %c0_i32_0 = arith.constant 0 : i32
    return %arg0, %c0_i32 : i32, i32
  }
}

</mosaic_0001>

<bundles_post_ra>
// kernel: tpu_custom_call.1
= control target key start
LH: loop header
LB: loop body
LE: loop exit
PB: predicated region body
PF: predicated region fallthrough
CT: control target
= control target key end

     0   :  { %s3512_s0 = inlined_call_operand.vmem [shape: bf16[1,32,8], index: 0, kind: input, shape index: {}]   ;;  %s3513_s1 = inlined_call_operand.vmem [shape: bf16[8,128,32], index: 1, kind: input, shape index: {}]   ;;  %s3514_s2 = inlined_call_operand.vmem [shape: bf16[1,32,1024], index: 2, kind: input, shape index: {}]   ;;  %s3515_s3 = inlined_call_operand.vmem [shape: bf16[1,16,1024], index: 3, kind: input, shape index: {}]   ;;  %s3516_s4 = inlined_call_operand.vmem [shape: f32[1,1,1024], index: 4, kind: input, shape index: {}]   ;;  %s3517_s5 = inlined_call_operand.vmem [shape: bf16[8,1024], index: 5, kind: input, shape index: {}]   ;;  %s3518_s6 = inlined_call_operand.vmem [shape: bf16[32,32], index: 6, kind: input, shape index: {}]   ;;  %s3519_s7 = inlined_call_operand.vmem [shape: bf16[32,16], index: 7, kind: input, shape index: {}]   ;;  %s3520_s8 = inlined_call_operand.vmem [shape: f32[1,32], index: 8, kind: input, shape index: {}]   ;;  %s3521_s9 = inlined_call_operand.<no memory space> [shape: f32[1,1], index: 9, kind: input, shape index: {}]   ;;  %s3522_s10 = inlined_call_operand.hbm [shape: f32[8,32], index: 10, kind: output, shape index: {0}]   ;;  %s3523_s11 = inlined_call_operand.hbm [shape: f32[8,128], index: 11, kind: output, shape index: {1}]  }
   0x1   :  { %v17_v0 = vstv %s3521_s9 }
   0x2   :  { %18 = vst [vmem:[#allocation2] sm:$0x1] %v17_v0 }
   0x3   :  { %19 = vsyncpa [#allocation4], 0  ;;  %v2594_v1 = vld [vmem:[%s3512_s0 + $0x8] sm:$0xff]   ;;  %v2595_v2 = vld [vmem:[%s3512_s0] sm:$0xff]   ;;  %vm72_vm0 = vcmask 261120  }
   0x4   :  { %2420 = vmatprep.subr.bf16.mxu0 %v2594_v1  ;;  %v2596_v3 = vld [vmem:[%s3518_s6] sm:$0xff]   ;;  %v2597_v4 = vld [vmem:[%s3518_s6 + $0x8] sm:$0xff]  }
   0x5   :  { %2421 = vmatpush3.bf16.msra.mxu0 %v2594_v1  ;;  %2424 = vmatprep.mubr.msk.bf16.mxu0 %vm72_vm0, %v2596_v3 }
   0x6   :  { %2422 = vmatprep.subr.bf16.mxu0 %v2595_v2 }
   0x9   :  { %2423 = vmatpush3.bf16.msra.mxu0 %v2595_v2 }
   0xc   :  { %2425 = vmatmul.mubr.msk.bf16.vlgmr.msra.gmra.mxu0 %vm72_vm0, %v2597_v4 }
   0xd   :  { %20 = vsyncpa [#allocation6], 0  ;;  %v130_v5 = vld [vmem:[%s3517_s5] sm:$0xff]  ;;  %v131_v6 = vld [vmem:[%s3517_s5 + $0x8] sm:$0xff]  ;;  %vm161_vm1 = vcmask 1043456   ;;  %v2812_v13 = vmov 0  }
   0xe   :  { %v2127_v7 = vcombine.high %v130_v5, %v130_v5  ;;  %v2129_v8 = vcombine.high %v131_v6, %v131_v6  ;;  %v2126_v9 = vcombine.low %v130_v5, %v130_v5  ;;  %v2128_v10 = vcombine.low %v131_v6, %v131_v6  ;;  %218 = vmatprep.mubr.bf16.mxu1 %v2812_v13  ;;  %v132_v14 = vld [vmem:[%s3517_s5 + $0x10] sm:$0xff]  ;;  %v133_v15 = vld [vmem:[%s3517_s5 + $0x18] sm:$0xff]  ;;  %v402_v25 = vld [vmem:[%s3515_s3] sm:$0xff] }
   0xf   :  { %271 = vmatprep.mubr.bf16.mxu0 %v2812_v13  ;;  %2593 = vset.pattern.permute.xlu0 %v2812_v13  ;;  %v2131_v16 = vcombine.high %v132_v14, %v132_v14  ;;  %v2130_v17 = vcombine.low %v132_v14, %v132_v14  ;;  %v2133_v18 = vcombine.high %v133_v15, %v133_v15  ;;  %v406_v26 = vld [vmem:[%s3515_s3 + $0x20] sm:$0xff]  ;;  %v403_v27 = vld [vmem:[%s3515_s3 + $0x8] sm:$0xff]  ;;  %vm154_vm2 = vcmask 64512   ;;  %v404_v34 = vld [vmem:[%s3515_s3 + $0x10] sm:$0xff] }
  0x10   :  { %2134 = vmatprep.subr.msk.bf16.mxu1 %vm161_vm1, %v2127_v7  ;;  %2137 = vmatprep.subr.msk.bf16.mxu0 %vm161_vm1, %v2129_v8  ;;  %v163_v11 = vsel %vm161_vm1, %v2126_v9, 0  ;;  %v169_v12 = vsel %vm161_vm1, %v2128_v10, 0  ;;  %v2132_v19 = vcombine.low %v133_v15, %v133_v15  ;;  %v407_v28 = vld [vmem:[%s3515_s3 + $0x28] sm:$0xff]  ;;  %v2149_v31 = vcombine.high %v402_v25, %v406_v26  ;;  %v408_v35 = vld [vmem:[%s3515_s3 + $0x30] sm:$0xff]  ;;  %v405_v36 = vld [vmem:[%s3515_s3 + $0x18] sm:$0xff] }
  0x11   :  { %201 = vmatpush1.bf16.msra.mxu1 %v163_v11  ;;  %254 = vmatpush1.bf16.msra.mxu0 %v169_v12  ;;  %v175_v20 = vsel %vm161_vm1, %v2130_v17, 0  ;;  %v2151_v32 = vcombine.high %v403_v27, %v407_v28  ;;  %v409_v37 = vld [vmem:[%s3515_s3 + $0x38] sm:$0xff]  ;;  %v2148_v38 = vcombine.low %v402_v25, %v406_v26  ;;  %v2150_v39 = vcombine.low %v403_v27, %v407_v28  ;;  %v2606_v42 = vld [vmem:[%s3519_s7] sm:$0xff]   ;;  %v2607_v45 = vld [vmem:[%s3519_s7 + $0x8] sm:$0xff]  }
  0x12   :  { %2140 = vmatprep.subr.msk.bf16.mxu1 %vm161_vm1, %v2131_v16  ;;  %2143 = vmatprep.subr.msk.bf16.mxu0 %vm161_vm1, %v2133_v18  ;;  %v181_v21 = vsel %vm161_vm1, %v2132_v19, 0  ;;  %v2153_v40 = vcombine.high %v404_v34, %v408_v35  ;;  %v2155_v41 = vcombine.high %v405_v36, %v409_v37  ;;  %vm460_vm3 = vcmask 130048   ;;  %v792_v47 = vld [vmem:[#allocation2] sm:$0x1]  ;;  %v680_v19 = vld [vmem:[%s3514_s2 + $0x8] sm:$0xff] }
  0x13   :  { %v2152_v43 = vcombine.low %v404_v34, %v408_v35  ;;  %v2154_v44 = vcombine.low %v405_v36, %v409_v37  ;;  %v2813_v46 = vmov 0.0   ;;  %795 = vperm.xlu0 %2593, %v792_v47   ;;  %v679_v18 = vld [vmem:[%s3514_s2] sm:$0xff]  ;;  %v697_v27 = vunpack.c.l.bf16 %v680_v19 }
  0x14   :  { %v683_v28 = vld [vmem:[%s3514_s2 + $0x20] sm:$0xff]  ;;  %v698_v35 = vunpack.c.h.bf16 %v680_v19  ;;  %vm1139_vm4 = vcmask 1040384   ;;  %vm2814_vm5 = vmmov 0   ;;  %vm1257_vm6 = vcmask 253952  }
  0xcc   :  { %v2426_v22 = vpop.f32.mrf.mxu0 }
  0xce   :  { %v113_v23 = vpop.f32.mrf.mxu0 }
  0xd0   :  { %v2427_v24 = vpop.f32.mrf.mxu0 }
  0xd1   :  { %v129_v33 = vpack.c.bf16 %v2427_v24, %v2426_v22 }
  0xd2   :  { %v116_v29 = vpop.f32.mrf.mxu0 }
  0xd3   :  { %v128_v30 = vpack.c.bf16 %v116_v29, %v113_v23  ;;  %v695_v23 = vunpack.c.l.bf16 %v679_v18 }
  0xd5   :  { %2135 = vmatmul.mubr.msk.bf16.vlgmr.msra.gmra.mxu1 %vm154_vm2, %v128_v30  ;;  %2138 = vmatmul.mubr.msk.bf16.vlgmr.msra.gmra.mxu0 %vm154_vm2, %v128_v30 }
  0xd6   :  { %228 = vmatprep.mubr.bf16.mxu1 %v2812_v13  ;;  %281 = vmatprep.mubr.bf16.mxu0 %v2812_v13 }
  0xd7   :  { %307 = vmatpush1.bf16.msra.mxu1 %v175_v20  ;;  %360 = vmatpush1.bf16.msra.mxu0 %v181_v21 }
  0xd8   :  { %481 = vmatprep.subr.bf16.mxu1 %v2149_v31  ;;  %534 = vmatprep.subr.bf16.mxu0 %v2151_v32  ;;  %v3041_v31 = vld [vmem:[%s3514_s2 + $0x28] sm:$0xff] }
  0xdd   :  { %2136 = vmatmul.mubr.msk.bf16.gmra.mxu1 %vm154_vm2, %v129_v33  ;;  %2139 = vmatmul.mubr.msk.bf16.gmra.mxu0 %vm154_vm2, %v129_v33 }
  0xde   :  { %324 = vmatprep.mubr.bf16.mxu1 %v2812_v13  ;;  %377 = vmatprep.mubr.bf16.mxu0 %v2812_v13 }
  0xe5   :  { %2141 = vmatmul.mubr.msk.bf16.vlgmr.msra.gmra.mxu1 %vm154_vm2, %v128_v30  ;;  %2144 = vmatmul.mubr.msk.bf16.vlgmr.msra.gmra.mxu0 %vm154_vm2, %v128_v30  ;;  %v696_v30 = vunpack.c.h.bf16 %v679_v18  ;;  %v688_v18 = vld [vmem:[%s3514_s2 + $0x48] sm:$0xff] }
  0xe6   :  { %334 = vmatprep.mubr.bf16.mxu1 %v2812_v13  ;;  %387 = vmatprep.mubr.bf16.mxu0 %v2812_v13 }
  0xe7   :  { %482 = vmatpush1.bf16.msra.mxu1 %v2148_v38  ;;  %535 = vmatpush1.bf16.msra.mxu0 %v2150_v39  ;;  %v703_v38 = vunpack.c.l.bf16 %v683_v28 }
  0xe8   :  { %587 = vmatprep.subr.bf16.mxu1 %v2153_v40  ;;  %640 = vmatprep.subr.bf16.mxu0 %v2155_v41 }
  0xed   :  { %2142 = vmatmul.mubr.msk.bf16.gmra.mxu1 %vm154_vm2, %v129_v33  ;;  %2145 = vmatmul.mubr.msk.bf16.gmra.mxu0 %vm154_vm2, %v129_v33 }
  0xee   :  { %499 = vmatprep.mubr.bf16.mxu1 %v2812_v13  ;;  %552 = vmatprep.mubr.bf16.mxu0 %v2812_v13 }
  0xf5   :  { %2156 = vmatmul.mubr.msk.bf16.vlgmr.msra.gmra.mxu1 %vm460_vm3, %v2606_v42  ;;  %2158 = vmatmul.mubr.msk.bf16.vlgmr.msra.gmra.mxu0 %vm460_vm3, %v2606_v42 }
  0xf6   :  { %509 = vmatprep.mubr.bf16.mxu1 %v2812_v13  ;;  %562 = vmatprep.mubr.bf16.mxu0 %v2812_v13 }
  0xf7   :  { %588 = vmatpush1.bf16.msra.mxu1 %v2152_v43  ;;  %641 = vmatpush1.bf16.msra.mxu0 %v2154_v44  ;;  %v705_v43 = vunpack.c.l.bf16 %v3041_v31  ;;  %v691_v44 = vld [vmem:[%s3514_s2 + $0x60] sm:$0xff] }
  0xfd   :  { %2157 = vmatmul.mubr.msk.bf16.gmra.mxu1 %vm460_vm3, %v2607_v45  ;;  %2159 = vmatmul.mubr.msk.bf16.gmra.mxu0 %vm460_vm3, %v2607_v45 }
  0xfe   :  { %605 = vmatprep.mubr.bf16.mxu1 %v2812_v13  ;;  %658 = vmatprep.mubr.bf16.mxu0 %v2812_v13 }
 0x105   :  { %2160 = vmatmul.mubr.msk.bf16.vlgmr.msra.gmra.mxu1 %vm460_vm3, %v2606_v42  ;;  %2162 = vmatmul.mubr.msk.bf16.vlgmr.msra.gmra.mxu0 %vm460_vm3, %v2606_v42 }
 0x106   :  { %615 = vmatprep.mubr.bf16.mxu1 %v2812_v13  ;;  %668 = vmatprep.mubr.bf16.mxu0 %v2812_v13 }
 0x10d   :  { %2161 = vmatmul.mubr.msk.bf16.gmra.mxu1 %vm460_vm3, %v2607_v45  ;;  %2163 = vmatmul.mubr.msk.bf16.gmra.mxu0 %vm460_vm3, %v2607_v45 }
 0x10e   :  { %869 = vmatprep.mubr.f32.mxu1 %v2813_v46  ;;  %1011 = vmatprep.mubr.f32.mxu0 %v2813_v46 }
 0x195   :  { %v220_v48 = vpop.f32.mrf.mxu1  ;;  %v273_v49 = vpop.f32.mrf.mxu0 }
 0x197   :  { %v222_v50 = vpop.f32.mrf.mxu1  ;;  %v275_v51 = vpop.f32.mrf.mxu0 }
 0x199   :  { %v224_v52 = vpop.f32.mrf.mxu1  ;;  %v277_v53 = vpop.f32.mrf.mxu0 }
 0x19b   :  { %v226_v54 = vpop.f32.mrf.mxu1  ;;  %v2979_v55 = vpop.f32.mrf.mxu0 }
 0x19d   :  { %v2981_v56 = vpop.f32.mrf.mxu1  ;;  %v2983_v57 = vpop.f32.mrf.mxu0 }
 0x19f   :  { %v2985_v58 = vpop.f32.mrf.mxu1  ;;  %v2987_v59 = vpop.f32.mrf.mxu0 }
 0x1a1   :  { %v2989_v60 = vpop.f32.mrf.mxu1  ;;  %v2991_v61 = vpop.f32.mrf.mxu0 }
 0x1a3   :  { %v2993_v62 = vpop.f32.mrf.mxu1  ;;  %v2995_v63 = vpop.f32.mrf.mxu0 }
 0x1a5   :  { %v2997_v0 = vpop.f32.mrf.mxu1  ;;  %v2999_v1 = vpop.f32.mrf.mxu0 }
 0x1a7   :  { %v3001_v2 = vpop.f32.mrf.mxu1  ;;  %v3003_v3 = vpop.f32.mrf.mxu0 }
 0x1a9   :  { %v3005_v4 = vpop.f32.mrf.mxu1  ;;  %v3007_v5 = vpop.f32.mrf.mxu0 }
 0x1ab   :  { %v3009_v6 = vpop.f32.mrf.mxu1  ;;  %v3011_v7 = vpop.f32.mrf.mxu0 }
 0x1ad   :  { %v3013_v8 = vpop.f32.mrf.mxu1  ;;  %v3015_v9 = vpop.f32.mrf.mxu0 }
 0x1af   :  { %v3017_v10 = vpop.f32.mrf.mxu1  ;;  %v3019_v11 = vpop.f32.mrf.mxu0 }
 0x1b1   :  { %v3021_v12 = vpop.f32.mrf.mxu1  ;;  %v3023_v13 = vpop.f32.mrf.mxu0 }
 0x1b3   :  { %v3025_v14 = vpop.f32.mrf.mxu1  ;;  %v3027_v15 = vpop.f32.mrf.mxu0 }
 0x1b5   :  { %v501_v16 = vpop.f32.mrf.mxu1  ;;  %v554_v17 = vpop.f32.mrf.mxu0 }
 0x1b6   :  { %v502_v22 = vadd.f32 %v501_v16, %v220_v48  ;;  %v555_v26 = vadd.f32 %v554_v17, %v273_v49  ;;  %v704_v48 = vunpack.c.h.bf16 %v683_v28  ;;  %v687_v49 = vld [vmem:[%s3514_s2 + $0x40] sm:$0xff]  ;;  %v706_v16 = vunpack.c.h.bf16 %v3041_v31 }
 0x1b7   :  { %v503_v20 = vpop.f32.mrf.mxu1  ;;  %v556_v21 = vpop.f32.mrf.mxu0  ;;  %v712_v17 = vunpack.c.h.bf16 %v687_v49  ;;  %v713_v31 = vunpack.c.l.bf16 %v688_v18 }
 0x1b8   :  { %v504_v29 = vadd.f32 %v503_v20, %v222_v50  ;;  %v557_v34 = vadd.f32 %v556_v21, %v275_v51  ;;  %v727_v36 = vadd.f32 %v695_v23, %v502_v22  ;;  %v729_v41 = vadd.f32 %v697_v27, %v555_v26 }
 0x1b9   :  { %v505_v24 = vpop.f32.mrf.mxu1  ;;  %v558_v25 = vpop.f32.mrf.mxu0  ;;  %v719_v20 = vunpack.c.l.bf16 %v691_v44  ;;  %v720_v21 = vunpack.c.h.bf16 %v691_v44  ;;  %v711_v27 = vunpack.c.l.bf16 %v687_v49 }
 0x1ba   :  { %v506_v37 = vadd.f32 %v505_v24, %v224_v52  ;;  %v559_v42 = vadd.f32 %v558_v25, %v277_v53  ;;  %v728_v45 = vadd.f32 %v696_v30, %v504_v29  ;;  %v730_v52 = vadd.f32 %v698_v35, %v557_v34 }
 0x1bb   :  { %v507_v32 = vpop.f32.mrf.mxu1  ;;  %v560_v33 = vpop.f32.mrf.mxu0  ;;  %2672 = vtanh.f32 %v727_v36 }
 0x1bc   :  { %v508_v47 = vadd.f32 %v507_v32, %v226_v54  ;;  %v735_v53 = vadd.f32 %v703_v38, %v506_v37  ;;  %2674 = vtanh.f32 %v729_v41  ;;  %v737_v22 = vadd.f32 %v705_v43, %v559_v42  ;;  %v692_v32 = vld [vmem:[%s3514_s2 + $0x68] sm:$0xff] }
 0x1bd   :  { %v511_v39 = vpop.f32.mrf.mxu1  ;;  %v564_v40 = vpop.f32.mrf.mxu0  ;;  %2676 = vtanh.f32 %v728_v45  ;;  %v561_v30 = vadd.f32 %v560_v33, %v2979_v55  ;;  %v681_v33 = vld [vmem:[%s3514_s2 + $0x10] sm:$0xff]  ;;  %v721_v41 = vunpack.c.l.bf16 %v692_v32  ;;  %v722_v44 = vunpack.c.h.bf16 %v692_v32 }
 0x1be   :  { %v736_v25 = vadd.f32 %v704_v48, %v508_v47  ;;  %v512_v26 = vadd.f32 %v511_v39, %v2981_v56  ;;  %2678 = vtanh.f32 %v730_v52  ;;  %v699_v48 = vunpack.c.l.bf16 %v681_v33 }
 0x1bf   :  { %v513_v50 = vpop.f32.mrf.mxu1  ;;  %v566_v51 = vpop.f32.mrf.mxu0  ;;  %2680 = vtanh.f32 %v735_v53  ;;  %v738_v42 = vadd.f32 %v706_v16, %v561_v30  ;;  %v700_v52 = vunpack.c.h.bf16 %v681_v33  ;;  %v689_v16 = vld [vmem:[%s3514_s2 + $0x50] sm:$0xff]  ;;  %v694_v30 = vld [vmem:[%s3514_s2 + $0x78] sm:$0xff] }
 0x1c0   :  { %v514_v23 = vadd.f32 %v513_v50, %v2985_v58  ;;  %v565_v58 = vadd.f32 %v564_v40, %v2983_v57  ;;  %2682 = vtanh.f32 %v737_v22  ;;  %v567_v38 = vadd.f32 %v566_v51, %v2987_v59  ;;  %v685_v59 = vld [vmem:[%s3514_s2 + $0x30] sm:$0xff] }
 0x1c1   :  { %v515_v19 = vpop.f32.mrf.mxu1  ;;  %v568_v54 = vpop.f32.mrf.mxu0  ;;  %2684 = vtanh.f32 %v736_v25  ;;  %v743_v39 = vadd.f32 %v711_v27, %v512_v26  ;;  %v707_v53 = vunpack.c.l.bf16 %v685_v59  ;;  %v715_v25 = vunpack.c.l.bf16 %v689_v16  ;;  %v693_v26 = vld [vmem:[%s3514_s2 + $0x70] sm:$0xff] }
 0x1c2   :  { %v516_v24 = vadd.f32 %v515_v19, %v2989_v60  ;;  %v714_v60 = vunpack.c.h.bf16 %v688_v18  ;;  %v744_v37 = vadd.f32 %v712_v17, %v514_v23  ;;  %v745_v45 = vadd.f32 %v713_v31, %v565_v58 }
 0x1c3   :  { %v517_v28 = vpop.f32.mrf.mxu1  ;;  %v570_v29 = vpop.f32.mrf.mxu0 }
 0x1c4   :  { %v518_v34 = vadd.f32 %v517_v28, %v2993_v62  ;;  %v751_v35 = vadd.f32 %v719_v20, %v516_v24  ;;  %v569_v62 = vadd.f32 %v568_v54, %v2991_v61  ;;  %v571_v43 = vadd.f32 %v570_v29, %v2995_v63  ;;  %v3083_v63 = vld [vmem:[%s3514_s2 + $0x38] sm:$0xff] }
 0x1c5   :  { %v607_v36 = vpop.f32.mrf.mxu1  ;;  %v3063_v56 = vpop.f32.mrf.mxu0  ;;  %v746_v50 = vadd.f32 %v714_v60, %v567_v38  ;;  %v708_v54 = vunpack.c.h.bf16 %v685_v59  ;;  %v709_v23 = vunpack.c.l.bf16 %v3083_v63  ;;  %v716_v29 = vunpack.c.h.bf16 %v689_v16 }
 0x1c6   :  { %v752_v55 = vadd.f32 %v720_v21, %v518_v34  ;;  %v608_v47 = vadd.f32 %v607_v36, %v2997_v0  ;;  %v753_v0 = vadd.f32 %v721_v41, %v569_v62  ;;  %v754_v20 = vadd.f32 %v722_v44, %v571_v43  ;;  %v3093_v21 = vld [vmem:[%s3514_s2 + $0x58] sm:$0xff] }
 0x1c7   :  { %v609_v57 = vpop.f32.mrf.mxu1  ;;  %v3070_v40 = vpop.f32.mrf.mxu0  ;;  %v717_v34 = vunpack.c.l.bf16 %v3093_v21  ;;  %v723_v38 = vunpack.c.l.bf16 %v693_v26  ;;  %v725_v41 = vunpack.c.l.bf16 %v694_v30  ;;  %v726_v59 = vunpack.c.h.bf16 %v694_v30 }
 0x1c8   :  { %2686 = vtanh.f32 %v752_v55  ;;  %v610_v51 = vadd.f32 %v609_v57, %v3001_v2  ;;  %v731_v22 = vadd.f32 %v699_v48, %v608_v47  ;;  %v3099_v27 = vpop.eup %2672  ;;  %v724_v57 = vunpack.c.h.bf16 %v693_v26 }
 0x1c9   :  { %2688 = vtanh.f32 %v751_v35  ;;  %v611_v49 = vpop.f32.mrf.mxu1  ;;  %v3077_v61 = vpop.f32.mrf.mxu0  ;;  %v718_v35 = vunpack.c.h.bf16 %v3093_v21 }
 0x1ca   :  { %2690 = vtanh.f32 %v744_v37  ;;  %v612_v17 = vadd.f32 %v611_v49, %v3005_v4  ;;  %v3105_v31 = vpop.eup %2674 }
 0x1cb   :  { %2692 = vtanh.f32 %v743_v39  ;;  %v613_v18 = vpop.f32.mrf.mxu1  ;;  %v666_v19 = vpop.f32.mrf.mxu0 }
 0x1cc   :  { %2694 = vtanh.f32 %v738_v42  ;;  %v614_v2 = vadd.f32 %v613_v18, %v3009_v6  ;;  %v732_v6 = vadd.f32 %v700_v52, %v610_v51  ;;  %v739_v32 = vadd.f32 %v707_v53, %v612_v17  ;;  %v3109_v36 = vpop.eup %2676  ;;  %v682_v17 = vld [vmem:[%s3514_s2 + $0x18] sm:$0xff] }
 0x1cd   :  { %2696 = vtanh.f32 %v745_v45  ;;  %v617_v24 = vpop.f32.mrf.mxu1  ;;  %v670_v4 = vpop.f32.mrf.mxu0 }
 0x1ce   :  { %2698 = vtanh.f32 %v746_v50  ;;  %v618_v28 = vadd.f32 %v617_v24, %v3013_v8  ;;  %v740_v37 = vadd.f32 %v708_v54, %v614_v2  ;;  %v3112_v55 = vpop.eup %2678  ;;  %v663_v2 = vadd.f32 %v3070_v40, %v3003_v3 }
 0x1cf   :  { %2700 = vtanh.f32 %v753_v0  ;;  %v619_v58 = vpop.f32.mrf.mxu1  ;;  %v672_v60 = vpop.f32.mrf.mxu0  ;;  %v702_v54 = vunpack.c.h.bf16 %v682_v17 }
 0x1d0   :  { %2702 = vtanh.f32 %v754_v20  ;;  %v620_v8 = vadd.f32 %v619_v58, %v3017_v10  ;;  %v747_v33 = vadd.f32 %v715_v25, %v618_v28  ;;  %v2681_v42 = vpop.eup %2680  ;;  %v671_v10 = vadd.f32 %v670_v4, %v3015_v9 }
 0x1d1   :  { %2704 = vtanh.f32 %v731_v22  ;;  %v621_v39 = vpop.f32.mrf.mxu1  ;;  %v674_v62 = vpop.f32.mrf.mxu0  ;;  %v673_v47 = vadd.f32 %v672_v60, %v3019_v11  ;;  %v665_v9 = vadd.f32 %v3077_v61, %v3007_v5  ;;  %v667_v11 = vadd.f32 %v666_v19, %v3011_v7 }
 0x1d2   :  { %2706 = vtanh.f32 %v732_v6  ;;  %v748_v43 = vadd.f32 %v716_v29, %v620_v8  ;;  %v622_v44 = vadd.f32 %v621_v39, %v3021_v12  ;;  %v3115_v45 = vpop.eup %2682  ;;  %v675_v48 = vadd.f32 %v674_v62, %v3023_v13  ;;  %v796_v62 = vpop.permute.xlu0 %795 }
 0x1d3   :  { %2708 = vtanh.f32 %v739_v32  ;;  %v623_v49 = vpop.f32.mrf.mxu1  ;;  %v676_v50 = vpop.f32.mrf.mxu0  ;;  %v710_v13 = vunpack.c.h.bf16 %v3083_v63  ;;  %v750_v21 = vadd.f32 %v718_v35, %v673_v47  ;;  %v661_v7 = vadd.f32 %v3063_v56, %v2999_v1  ;;  %v791_v1 = vld [vmem:[%s3520_s8] sm:$0x1] }
 0x1d4   :  { %v2685_v51 = vpop.eup %2684  ;;  %2710 = vtanh.f32 %v740_v37  ;;  %v755_v52 = vadd.f32 %v723_v38, %v622_v44  ;;  %v624_v16 = vadd.f32 %v623_v49, %v3025_v14  ;;  %v677_v0 = vadd.f32 %v676_v50, %v3027_v15 }
 0x1d5   :  { %v2687_v12 = vpop.eup %2686  ;;  %2712 = vtanh.f32 %v747_v33  ;;  %v757_v18 = vadd.f32 %v725_v41, %v675_v48  ;;  %v701_v61 = vunpack.c.l.bf16 %v682_v17  ;;  %v749_v19 = vadd.f32 %v717_v34, %v671_v10  ;;  %v1089_v41 = vld [vmem:[%s3516_s4] sm:$0xff] }
 0x1d6   :  { %v2689_v53 = vpop.eup %2688  ;;  %2714 = vtanh.f32 %v748_v43  ;;  %v756_v20 = vadd.f32 %v724_v57, %v624_v16  ;;  %v758_v14 = vadd.f32 %v726_v59, %v677_v0  ;;  %829 = vmatprep.subr.mxu1 %v2687_v12  ;;  %v742_v24 = vadd.f32 %v710_v13, %v667_v11 }
 0x1d7   :  { %v2691_v15 = vpop.eup %2690  ;;  %2716 = vtanh.f32 %v755_v52  ;;  %830 = vmatpush1.msra.mxu1 %v2689_v53  ;;  %v741_v3 = vadd.f32 %v709_v23, %v665_v9  ;;  %v734_v4 = vadd.f32 %v702_v54, %v663_v2  ;;  %v733_v26 = vadd.f32 %v701_v61, %v661_v7 }
 0x1d8   :  { %v2693_v5 = vpop.eup %2692  ;;  %2718 = vtanh.f32 %v756_v20  ;;  %831 = vmatprep.subr.mxu1 %v2691_v15 }
 0x1d9   :  { %v2695_v22 = vpop.eup %2694  ;;  %2720 = vtanh.f32 %v758_v14  ;;  %832 = vmatpush1.msra.mxu1 %v2693_v5 }
 0x1da   :  { %v2697_v25 = vpop.eup %2696  ;;  %2722 = vtanh.f32 %v757_v18  ;;  %833 = vmatprep.subr.mxu1 %v2685_v51 }
 0x1db   :  { %v2699_v40 = vpop.eup %2698  ;;  %2724 = vtanh.f32 %v750_v21  ;;  %834 = vmatpush1.msra.mxu1 %v2681_v42 }
 0x1dc   :  { %v2701_v56 = vpop.eup %2700  ;;  %2726 = vtanh.f32 %v749_v19  ;;  %835 = vmatprep.subr.mxu1 %v3109_v36 }
 0x1dd   :  { %v2703_v6 = vpop.eup %2702  ;;  %2728 = vtanh.f32 %v742_v24  ;;  %836 = vmatpush1.msra.mxu1 %v3099_v27 }
 0x1de   :  { %v2705_v63 = vpop.eup %2704  ;;  %2730 = vtanh.f32 %v741_v3  ;;  %2164 = vmatmul.mubr.msk.f32.vlgmr.msra.gmra.mxu1 %vm72_vm0, %v791_v1  ;;  %900 = vmatprep.subr.mxu1 %v2703_v6 }
 0x1df   :  { %v2707_v23 = vpop.eup %2706  ;;  %2732 = vtanh.f32 %v734_v4  ;;  %901 = vmatpush1.msra.mxu1 %v2701_v56  ;;  %940 = vmatprep.mubr.f32.mxu1 %v2813_v46 }
 0x1e0   :  { %v2709_v28 = vpop.eup %2708  ;;  %2734 = vtanh.f32 %v733_v26  ;;  %902 = vmatprep.subr.mxu1 %v2699_v40 }
 0x1e1   :  { %v2711_v29 = vpop.eup %2710  ;;  %903 = vmatpush1.msra.mxu1 %v2697_v25 }
 0x1e2   :  { %v2713_v30 = vpop.eup %2712  ;;  %904 = vmatprep.subr.mxu1 %v2695_v22 }
 0x1e3   :  { %v2715_v32 = vpop.eup %2714  ;;  %905 = vmatpush1.msra.mxu1 %v3115_v45 }
 0x1e4   :  { %v2717_v27 = vpop.eup %2716  ;;  %906 = vmatprep.subr.mxu1 %v3112_v55  ;;  %v798_v55 = vlaneseq }
 0x1e5   :  { %v2719_v34 = vpop.eup %2718  ;;  %907 = vmatpush1.msra.mxu1 %v3105_v31 }
 0x1e6   :  { %v2721_v58 = vpop.eup %2720  ;;  %2165 = vmatmul.mubr.msk.f32.vlgmr.msra.gmra.mxu1 %vm72_vm0, %v791_v1  ;;  %971 = vmatprep.subr.mxu0 %v2719_v34  ;;  %v799_v33 = vshrl.u32 %v798_v55, 7  ;;  %v2612_v34 = vld [vmem:[%s3513_s1 + $0x70] sm:$0xff]  }
 0x1e7   :  { %v2723_v60 = vpop.eup %2722  ;;  %1042 = vmatprep.subr.mxu1 %v2721_v58  ;;  %972 = vmatpush1.msra.mxu0 %v2717_v27  ;;  %v2609_v27 = vld [vmem:[%s3513_s1 + $0x30] sm:$0xff]   ;;  %v2611_v58 = vld [vmem:[%s3513_s1 + $0x28] sm:$0xff]  }
 0x1e8   :  { %v2725_v35 = vpop.eup %2724  ;;  %1043 = vmatpush1.msra.mxu1 %v2723_v60  ;;  %973 = vmatprep.subr.mxu0 %v2715_v32  ;;  %v800_v39 = vsub.s32 0, %v799_v33  ;;  %v1097_v42 = vsub.s32 1, %v799_v33  ;;  %v1101_v49 = vsub.s32 2, %v799_v33  ;;  %v1105_v52 = vsub.s32 3, %v799_v33  ;;  %v2610_v32 = vld [vmem:[%s3513_s1 + $0x78] sm:$0xff]   ;;  %v2614_v60 = vld [vmem:[%s3513_s1 + $0x68] sm:$0xff]  }
 0x1e9   :  { %v2727_v36 = vpop.eup %2726  ;;  %1044 = vmatprep.subr.mxu1 %v2725_v35  ;;  %974 = vmatpush1.msra.mxu0 %v2713_v30  ;;  %v1109_v18 = vsub.s32 4, %v799_v33  ;;  %v1117_v20 = vsub.s32 6, %v799_v33  ;;  %v1113_v2 = vsub.s32 5, %v799_v33  ;;  %v1121_v54 = vsub.s32 7, %v799_v33  ;;  %v2608_v30 = vld [vmem:[%s3513_s1 + $0x38] sm:$0xff]   ;;  %v2613_v35 = vld [vmem:[%s3513_s1 + $0x20] sm:$0xff]  }
 0x1ea   :  { %v2729_v37 = vpop.eup %2728  ;;  %1045 = vmatpush1.msra.mxu1 %v2727_v36  ;;  %975 = vmatprep.subr.mxu0 %v2711_v29  ;;  %v801_v57 = vrot.slane %v796_v62, %v800_v39  ;;  %v1094_v43 = vrot.slane %v1089_v41, %v800_v39  ;;  %v1098_v45 = vrot.slane %v1089_v41, %v1097_v42 }
 0x1eb   :  { %v2731_v8 = vpop.eup %2730  ;;  %1046 = vmatprep.subr.mxu1 %v2729_v37  ;;  %976 = vmatpush1.msra.mxu0 %v2709_v28  ;;  %v1102_v0 = vrot.slane %v1089_v41, %v1101_v49  ;;  %v1106_v9 = vrot.slane %v1089_v41, %v1105_v52  ;;  %v1110_v21 = vrot.slane %v1089_v41, %v1109_v18 }
 0x1ec   :  { %v2733_v31 = vpop.eup %2732  ;;  %1047 = vmatpush1.msra.mxu1 %v2731_v8  ;;  %977 = vmatprep.subr.mxu0 %v2707_v23  ;;  %v1118_v5 = vrot.slane %v1089_v41, %v1117_v20  ;;  %v1114_v25 = vrot.slane %v1089_v41, %v1113_v2  ;;  %v1122_v3 = vrot.slane %v1089_v41, %v1121_v54  ;;  %v2619_v2 = vld [vmem:[%s3513_s1 + $0x8] sm:$0xff]   ;;  %v2620_v54 = vld [vmem:[%s3513_s1 + $0x50] sm:$0xff]  }
 0x1ed   :  { %v2735_v38 = vpop.eup %2734  ;;  %1048 = vmatprep.subr.mxu1 %v2733_v31  ;;  %978 = vmatpush1.msra.mxu0 %v2705_v63 }
 0x1ee   :  { %1049 = vmatpush1.msra.mxu1 %v2735_v38  ;;  %1082 = vmatprep.mubr.f32.mxu1 %v2813_v46 }
 0x1ef   :  { %2166 = vmatmul.mubr.msk.f32.vlgmr.msra.gmra.mxu0 %vm72_vm0, %v791_v1  ;;  %2167 = vmatmul.mubr.msk.f32.vlgmr.msra.gmra.mxu1 %vm72_vm0, %v791_v1 }
 0x1f0   :  { %2428 = vmatprep.subr.bf16.mxu0 %v2813_v46  ;;  %2448 = vmatprep.subr.bf16.mxu1 %v2813_v46 }
 0x1f1   :  { %2429 = vmatpush3.bf16.msra.mxu0 %v2608_v30  ;;  %2449 = vmatpush3.bf16.msra.mxu1 %v2610_v32 }
 0x1f2   :  { %2430 = vmatprep.subr.bf16.mxu0 %v2813_v46  ;;  %2450 = vmatprep.subr.bf16.mxu1 %v2813_v46 }
 0x1f3   :  { %2444 = vmatprep.mubr.msk.bf16.mxu0 %vm2814_vm5, %v2813_v46  ;;  %2464 = vmatprep.mubr.msk.bf16.mxu1 %vm2814_vm5, %v2813_v46 }
 0x1f5   :  { %2431 = vmatpush3.bf16.msra.mxu0 %v2609_v27  ;;  %2451 = vmatpush3.bf16.msra.mxu1 %v2612_v34  ;;  %v2626_v34 = vld [vmem:[%s3513_s1 + $0xf8] sm:$0xff]  }
 0x1f6   :  { %2432 = vmatprep.subr.bf16.mxu0 %v2813_v46  ;;  %2452 = vmatprep.subr.bf16.mxu1 %v2813_v46 }
 0x1f9   :  { %2433 = vmatpush3.bf16.msra.mxu0 %v2611_v58  ;;  %2453 = vmatpush3.bf16.msra.mxu1 %v2614_v60 }
 0x1fa   :  { %2434 = vmatprep.subr.bf16.mxu0 %v2813_v46  ;;  %2454 = vmatprep.subr.bf16.mxu1 %v2813_v46 }
 0x1fd   :  { %2435 = vmatpush3.bf16.msra.mxu0 %v2613_v35 }
 0x1fe   :  { %2436 = vmatprep.subr.bf16.mxu0 %v2813_v46 }
 0x29e   :  { %v871_v44 = vpop.f32.mrf.mxu1 }
 0x29f   :  { %v872_v59 = vadd.f32 %v871_v44, %v801_v57 }
 0x2a0   :  { %v873_v10 = vpop.f32.mrf.mxu1 }
 0x2a1   :  { %v874_v47 = vadd.f32 %v873_v10, %v801_v57  ;;  %v3154_v48 = vadd.f32 %v1094_v43, %v872_v59 }
 0x2a3   :  { %v1140_v50 = vsel %vm1139_vm4, %v3154_v48, -inf  ;;  %v3158_v51 = vadd.f32 %v1098_v45, %v874_v47 }
 0x2a4   :  { %1141 = vmax.xlane.f32.xlu0 %v1140_v50 }
 0x2a5   :  { %v1259_v16 = vsel %vm1139_vm4, %v3158_v51, -inf }
 0x2a6   :  { %v942_v12 = vpop.f32.mrf.mxu1  ;;  %1260 = vmax.xlane.f32.xlu1 %v1259_v16 }
 0x2a7   :  { %v943_v17 = vadd.f32 %v942_v12, %v801_v57  ;;  %v2615_v12 = vld [vmem:[%s3513_s1 + $0x18] sm:$0xff]  }
 0x2a8   :  { %v944_v11 = vpop.f32.mrf.mxu1  ;;  %2437 = vmatpush3.bf16.msra.mxu0 %v2615_v12 }
 0x2a9   :  { %v945_v13 = vadd.f32 %v944_v11, %v801_v57  ;;  %v1133_v53 = vadd.f32 %v1102_v0, %v943_v17  ;;  %v2616_v17 = vld [vmem:[%s3513_s1 + $0x60] sm:$0xff]   ;;  %2438 = vmatprep.subr.bf16.mxu0 %v2813_v46 }
 0x2aa   :  { %2455 = vmatpush3.bf16.msra.mxu1 %v2616_v17  ;;  %v2641_v17 = vld [vmem:[%s3513_s1 + $0x130] sm:$0xff]  }
 0x2ab   :  { %v1378_v14 = vsel %vm1139_vm4, %v1133_v53, -inf  ;;  %v1134_v15 = vadd.f32 %v1106_v9, %v945_v13  ;;  %2456 = vmatprep.subr.bf16.mxu1 %v2813_v46  ;;  %v2617_v13 = vld [vmem:[%s3513_s1 + $0x10] sm:$0xff]  }
 0x2ac   :  { %1379 = vmax.xlane.f32.xlu1 %v1378_v14  ;;  %2439 = vmatpush3.bf16.msra.mxu0 %v2617_v13  ;;  %v2643_v13 = vld [vmem:[%s3513_s1 + $0x128] sm:$0xff]  }
 0x2ad   :  { %v1497_v19 = vsel %vm1139_vm4, %v1134_v15, -inf  ;;  %2440 = vmatprep.subr.bf16.mxu0 %v2813_v46 }
 0x2af   :  { %v1013_v7 = vpop.f32.mrf.mxu0  ;;  %v1084_v61 = vpop.f32.mrf.mxu1 }
 0x2b0   :  { %v1014_v22 = vadd.f32 %v1013_v7, %v801_v57  ;;  %v1085_v24 = vadd.f32 %v1084_v61, %v801_v57  ;;  %1498 = vmax.xlane.f32.xlu1 %v1497_v19  ;;  %2441 = vmatpush3.bf16.msra.mxu0 %v2619_v2  ;;  %v2622_v7 = vld [vmem:[%s3513_s1 + $0x48] sm:$0xff]   ;;  %v2623_v61 = vld [vmem:[%s3513_s1 + $0x40] sm:$0xff]   ;;  %v2649_v2 = vld [vmem:[%s3513_s1 + $0x110] sm:$0xff]  }
 0x2b1   :  { %v1015_v40 = vpop.f32.mrf.mxu0  ;;  %v1086_v4 = vpop.f32.mrf.mxu1  ;;  %2442 = vmatprep.subr.bf16.mxu0 %v2813_v46 }
 0x2b2   :  { %v1016_v1 = vadd.f32 %v1015_v40, %v801_v57  ;;  %v1087_v56 = vadd.f32 %v1086_v4, %v801_v57  ;;  %v1135_v26 = vadd.f32 %v1110_v21, %v1014_v22  ;;  %v3164_v6 = vadd.f32 %v1118_v5, %v1085_v24  ;;  %v2621_v5 = vld [vmem:[%s3513_s1] sm:$0xff]  }
 0x2b4   :  { %v1616_v63 = vsel %vm1139_vm4, %v1135_v26, -inf  ;;  %v1136_v23 = vadd.f32 %v1114_v25, %v1016_v1  ;;  %v3167_v28 = vadd.f32 %v1122_v3, %v1087_v56  ;;  %v1854_v0 = vsel %vm1139_vm4, %v3164_v6, -inf  ;;  %2443 = vmatpush3.bf16.msra.mxu0 %v2621_v5  ;;  %v2652_v5 = vld [vmem:[%s3513_s1 + $0x150] sm:$0xff]  }
 0x2b5   :  { %1617 = vmax.xlane.f32.xlu1 %v1616_v63  ;;  %2468 = vmatprep.subr.bf16.mxu0 %v2813_v46 }
 0x2b6   :  { %v1735_v29 = vsel %vm1139_vm4, %v1136_v23, -inf  ;;  %v1973_v9 = vsel %vm1139_vm4, %v3167_v28, -inf }
 0x2b9   :  { %1736 = vmax.xlane.f32.xlu1 %v1735_v29  ;;  %v2624_v29 = vld [vmem:[%s3513_s1 + $0xb8] sm:$0xff]  }
 0x32d   :  { %v1142_v36 = vpop.xlane.xlu0 %1141 }
 0x32e   :  { %v1143_v37 = vsub.f32 %v3154_v48, %v1142_v36 }
 0x32f   :  { %v1261_v8 = vpop.xlane.xlu1 %1260 }
 0x330   :  { %v1144_v31 = vmul.f32 1.442695, %v1143_v37  ;;  %v1262_v38 = vsub.f32 %v3158_v51, %v1261_v8  ;;  %v2627_v37 = vld [vmem:[%s3513_s1 + $0xa8] sm:$0xff]   ;;  %v2628_v8 = vld [vmem:[%s3513_s1 + $0xf0] sm:$0xff]  }
 0x332   :  { %2736 = vpow2.f32 %v1144_v31  ;;  %v1263_v55 = vmul.f32 1.442695, %v1262_v38 }
 0x334   :  { %2738 = vpow2.f32 %v1263_v55  ;;  %v2629_v55 = vld [vmem:[%s3513_s1 + $0xa0] sm:$0xff]  }
 0x335   :  { %v1380_v33 = vpop.xlane.xlu1 %1379 }
 0x336   :  { %v1381_v39 = vsub.f32 %v1133_v53, %v1380_v33  ;;  %v2618_v53 = vld [vmem:[%s3513_s1 + $0x58] sm:$0xff]   ;;  %v2630_v33 = vld [vmem:[%s3513_s1 + $0xe8] sm:$0xff]  }
 0x337   :  { %2457 = vmatpush3.bf16.msra.mxu1 %v2618_v53  ;;  %v2644_v53 = vld [vmem:[%s3513_s1 + $0x170] sm:$0xff]  }
 0x338   :  { %v1382_v62 = vmul.f32 1.442695, %v1381_v39  ;;  %2458 = vmatprep.subr.bf16.mxu1 %v2813_v46 }
 0x339   :  { %v1499_v41 = vpop.xlane.xlu1 %1498 }
 0x33a   :  { %2740 = vpow2.f32 %v1382_v62  ;;  %v1500_v57 = vsub.f32 %v1134_v15, %v1499_v41 }
 0x33b   :  { %2459 = vmatpush3.bf16.msra.mxu1 %v2620_v54  ;;  %v2650_v54 = vld [vmem:[%s3513_s1 + $0x158] sm:$0xff]  }
 0x33c   :  { %v1501_v42 = vmul.f32 1.442695, %v1500_v57  ;;  %2460 = vmatprep.subr.bf16.mxu1 %v2813_v46 }
 0x33e   :  { %v1618_v43 = vpop.xlane.xlu1 %1617  ;;  %2742 = vpow2.f32 %v1501_v42  ;;  %v2631_v42 = vld [vmem:[%s3513_s1 + $0x98] sm:$0xff]  }
 0x33f   :  { %v3200_v44 = vpop.eup %2736  ;;  %v1619_v59 = vsub.f32 %v1135_v26, %v1618_v43  ;;  %2461 = vmatpush3.bf16.msra.mxu1 %v2622_v7  ;;  %v2632_v43 = vld [vmem:[%s3513_s1 + $0xe0] sm:$0xff]  }
 0x340   :  { %v1146_v45 = vsel %vm1139_vm4, %v3200_v44, 0.0  ;;  %2462 = vmatprep.subr.bf16.mxu1 %v2813_v46  ;;  %v2653_v7 = vld [vmem:[%s3513_s1 + $0x100] sm:$0xff]  }
 0x341   :  { %v3204_v10 = vpop.eup %2738  ;;  %v1620_v47 = vmul.f32 1.442695, %v1619_v59  ;;  %1147 = vadd.xlane.f32.xlu1 %v1146_v45 }
 0x342   :  { %v1737_v48 = vpop.xlane.xlu1 %1736  ;;  %v1265_v50 = vsel %vm1139_vm4, %v3204_v10, 0.0 }
 0x343   :  { %2744 = vpow2.f32 %v1620_v47  ;;  %v1738_v49 = vsub.f32 %v1136_v23, %v1737_v48  ;;  %2463 = vmatpush3.bf16.msra.mxu1 %v2623_v61  ;;  %v2634_v47 = vld [vmem:[%s3513_s1 + $0xd8] sm:$0xff]   ;;  %v2654_v61 = vld [vmem:[%s3513_s1 + $0x148] sm:$0xff]  }
 0x344   :  { %2488 = vmatprep.subr.bf16.mxu1 %v2813_v46 }
 0x345   :  { %v1739_v51 = vmul.f32 1.442695, %v1738_v49  ;;  %1266 = vadd.xlane.f32.xlu1 %v1265_v50  ;;  %v2635_v49 = vld [vmem:[%s3513_s1 + $0x88] sm:$0xff]   ;;  %v2636_v50 = vld [vmem:[%s3513_s1 + $0xd0] sm:$0xff]  }
 0x347   :  { %v3208_v52 = vpop.eup %2740  ;;  %2746 = vpow2.f32 %v1739_v51  ;;  %v2637_v51 = vld [vmem:[%s3513_s1 + $0x80] sm:$0xff]  }
 0x348   :  { %v1384_v16 = vsel %vm1139_vm4, %v3208_v52, 0.0 }
 0x349   :  { %1385 = vadd.xlane.f32.xlu0 %v1384_v16  ;;  %1855 = vmax.xlane.f32.xlu1 %v1854_v0  ;;  %v2639_v16 = vld [vmem:[%s3513_s1 + $0xc0] sm:$0xff]   ;;  %v2640_v0 = vld [vmem:[%s3513_s1 + $0x138] sm:$0xff]  }
 0x34b   :  { %v3222_v11 = vpop.eup %2742 }
 0x34c   :  { %v1503_v20 = vsel %vm1139_vm4, %v3222_v11, 0.0 }
 0x34d   :  { %1974 = vmax.xlane.f32.xlu1 %v1973_v9  ;;  %v2642_v9 = vld [vmem:[%s3513_s1 + $0x178] sm:$0xff]  }
 0x350   :  { %v3232_v18 = vpop.eup %2744 }
 0x351   :  { %v1622_v14 = vsel %vm1139_vm4, %v3232_v18, 0.0  ;;  %1504 = vadd.xlane.f32.xlu1 %v1503_v20  ;;  %v2646_v20 = vld [vmem:[%s3513_s1 + $0x168] sm:$0xff]  }
 0x352   :  { %1623 = vadd.xlane.f32.xlu0 %v1622_v14  ;;  %v2647_v14 = vld [vmem:[%s3513_s1 + $0x118] sm:$0xff]  }
 0x354   :  { %v3240_v15 = vpop.eup %2746 }
 0x355   :  { %v1741_v21 = vsel %vm1139_vm4, %v3240_v15, 0.0 }
 0x356   :  { %1742 = vadd.xlane.f32.xlu1 %v1741_v21  ;;  %v2651_v21 = vld [vmem:[%s3513_s1 + $0x108] sm:$0xff]  }
 0x3ca   :  { %v1148_v19 = vpop.xlane.xlu1 %1147 }
 0x3cb   :  { %2748 = vrcp.f32 %v1148_v19  ;;  %v2655_v19 = vld [vmem:[%s3513_s1 + $0x140] sm:$0xff]  }
 0x3ce   :  { %v1267_v22 = vpop.xlane.xlu1 %1266 }
 0x3cf   :  { %2750 = vrcp.f32 %v1267_v22  ;;  %v2656_v22 = vld [vmem:[%s3513_s1 + $0x1b8] sm:$0xff]  }
 0x3d2   :  { %v1856_v24 = vpop.xlane.xlu1 %1855  ;;  %v1386_v25 = vpop.xlane.xlu0 %1385 }
 0x3d3   :  { %v1857_v3 = vsub.f32 %v3164_v6, %v1856_v24  ;;  %2752 = vrcp.f32 %v1386_v25  ;;  %v2657_v25 = vld [vmem:[%s3513_s1 + $0x1b0] sm:$0xff]  }
 0x3d5   :  { %v1858_v40 = vmul.f32 1.442695, %v1857_v3  ;;  %v2658_v3 = vld [vmem:[%s3513_s1 + $0x1f8] sm:$0xff]  }
 0x3d6   :  { %v1975_v4 = vpop.xlane.xlu1 %1974 }
 0x3d7   :  { %2754 = vpow2.f32 %v1858_v40  ;;  %v1976_v1 = vsub.f32 %v3167_v28, %v1975_v4  ;;  %v2625_v28 = vld [vmem:[%s3513_s1 + $0xb0] sm:$0xff]   ;;  %v2659_v4 = vld [vmem:[%s3513_s1 + $0x1a8] sm:$0xff]  }
 0x3d8   :  { %v2749_v56 = vpop.eup %2748 }
 0x3d9   :  { %v1977_v26 = vmul.f32 1.442695, %v1976_v1  ;;  %v1150_v63 = vmul.f32 %v2749_v56, %v3200_v44  ;;  %v2660_v1 = vld [vmem:[%s3513_s1 + $0x1f0] sm:$0xff]   ;;  %v2661_v56 = vld [vmem:[%s3513_s1 + $0x1a0] sm:$0xff]  }
 0x3da   :  { %v1505_v23 = vpop.xlane.xlu1 %1504 }
 0x3db   :  { %2756 = vpow2.f32 %v1977_v26  ;;  %v1624_v30 = vpop.xlane.xlu0 %1623  ;;  %v1151_v32 = vpack.c.bf16 %v1150_v63, %v1150_v63  ;;  %1256 = vst [vmem:[#allocation5] sm:$0x1] %v1150_v63  ;;  %v2662_v26 = vld [vmem:[%s3513_s1 + $0x1e8] sm:$0xff]   ;;  %v2663_v63 = vld [vmem:[%s3513_s1 + $0x1e0] sm:$0xff]  }
 0x3dc   :  { %v2751_v6 = vpop.eup %2750  ;;  %2758 = vrcp.f32 %v1505_v23  ;;  %v2664_v23 = vld [vmem:[%s3513_s1 + $0x198] sm:$0xff]  }
 0x3dd   :  { %2760 = vrcp.f32 %v1624_v30  ;;  %2445 = vmatmul.mubr.bf16.vlgmr.msra.gmra.mxu0 %v1151_v32  ;;  %v1269_v27 = vmul.f32 %v2751_v6, %v3204_v10  ;;  %v2633_v10 = vld [vmem:[%s3513_s1 + $0x90] sm:$0xff]   ;;  %v2666_v30 = vld [vmem:[%s3513_s1 + $0x1d8] sm:$0xff]   ;;  %v2667_v32 = vld [vmem:[%s3513_s1 + $0x188] sm:$0xff]  }
 0x3de   :  { %2469 = vmatpush3.bf16.msra.mxu0 %v2624_v29  ;;  %2484 = vmatprep.mubr.msk.bf16.mxu0 %vm2814_vm5, %v2813_v46  ;;  %v2665_v29 = vld [vmem:[%s3513_s1 + $0x190] sm:$0xff]  }
 0x3df   :  { %v1743_v58 = vpop.xlane.xlu1 %1742  ;;  %2470 = vmatprep.subr.bf16.mxu0 %v2813_v46  ;;  %v1270_v60 = vpack.c.bf16 %v1269_v27, %v1269_v27  ;;  %1376 = vst [vmem:[#allocation5 + $0x1] sm:$0x1] %v1269_v27  ;;  %v2668_v6 = vld [vmem:[%s3513_s1 + $0x1d0] sm:$0xff]   ;;  %v2669_v27 = vld [vmem:[%s3513_s1 + $0x180] sm:$0xff]  }
 0x3e0   :  { %v2753_v35 = vpop.eup %2752  ;;  %2762 = vrcp.f32 %v1743_v58 }
 0x3e1   :  { %2465 = vmatmul.mubr.bf16.vlgmr.msra.gmra.mxu1 %v1270_v60  ;;  %v1388_v36 = vmul.f32 %v2753_v35, %v3208_v52  ;;  %v2638_v52 = vld [vmem:[%s3513_s1 + $0xc8] sm:$0xff]  }
 0x3e2   :  { %2471 = vmatpush3.bf16.msra.mxu0 %v2625_v28  ;;  %2489 = vmatpush3.bf16.msra.mxu1 %v2626_v34  ;;  %v2670_v28 = vld [vmem:[%s3513_s1 + $0x1c8] sm:$0xff]   ;;  %v2671_v34 = vld [vmem:[%s3513_s1 + $0x1c0] sm:$0xff]  }
 0x3e3   :  { %2472 = vmatprep.subr.bf16.mxu0 %v2813_v46  ;;  %2490 = vmatprep.subr.bf16.mxu1 %v2813_v46  ;;  %1495 = vst [vmem:[#allocation5 + $0x2] sm:$0x1] %v1388_v36  ;;  %v1389_v12 = vpack.c.bf16 %v1388_v36, %v1388_v36 }
 0x3e4   :  { %v3293_v31 = vpop.eup %2754  ;;  %2504 = vmatprep.mubr.msk.bf16.mxu1 %vm2814_vm5, %v2813_v46 }
 0x3e5   :  { %v1860_v38 = vsel %vm1139_vm4, %v3293_v31, 0.0 }
 0x3e6   :  { %2473 = vmatpush3.bf16.msra.mxu0 %v2627_v37  ;;  %2491 = vmatpush3.bf16.msra.mxu1 %v2628_v8 }
 0x3e7   :  { %1861 = vadd.xlane.f32.xlu0 %v1860_v38  ;;  %2474 = vmatprep.subr.bf16.mxu0 %v2813_v46 }
 0x3e8   :  { %v3306_v39 = vpop.eup %2756  ;;  %2492 = vmatprep.subr.bf16.mxu1 %v2813_v46 }
 0x3e9   :  { %v2759_v62 = vpop.eup %2758  ;;  %v1979_v41 = vsel %vm1139_vm4, %v3306_v39, 0.0 }
 0x3ea   :  { %v2761_v57 = vpop.eup %2760  ;;  %2475 = vmatpush3.bf16.msra.mxu0 %v2629_v55  ;;  %2493 = vmatpush3.bf16.msra.mxu1 %v2630_v33  ;;  %v1507_v44 = vmul.f32 %v2759_v62, %v3222_v11 }
 0x3eb   :  { %1980 = vadd.xlane.f32.xlu1 %v1979_v41  ;;  %2476 = vmatprep.subr.bf16.mxu0 %v2813_v46  ;;  %v3320_v59 = vmul.f32 %v2761_v57, %v3232_v18  ;;  %v2645_v18 = vld [vmem:[%s3513_s1 + $0x120] sm:$0xff]  }
 0x3ec   :  { %2494 = vmatprep.subr.bf16.mxu1 %v2813_v46  ;;  %1614 = vst [vmem:[#allocation5 + $0x3] sm:$0x1] %v1507_v44  ;;  %v1508_v11 = vpack.c.bf16 %v1507_v44, %v1507_v44 }
 0x3ed   :  { %v2763_v45 = vpop.eup %2762  ;;  %1733 = vst [vmem:[#allocation5 + $0x4] sm:$0x1] %v3320_v59  ;;  %v1627_v24 = vpack.c.bf16 %v3320_v59, %v3320_v59 }
 0x3ee   :  { %2477 = vmatpush3.bf16.msra.mxu0 %v2631_v42  ;;  %2495 = vmatpush3.bf16.msra.mxu1 %v2632_v43  ;;  %v3331_v48 = vmul.f32 %v2763_v45, %v3240_v15  ;;  %v2648_v15 = vld [vmem:[%s3513_s1 + $0x160] sm:$0xff]   ;;  %s2815_s1 = smov [#allocation5]  }
 0x3ef   :  { %2478 = vmatprep.subr.bf16.mxu0 %v2813_v46  ;;  %2496 = vmatprep.subr.bf16.mxu1 %v2813_v46  ;;  %s2108_s28 = sshll.u32 %s2815_s1, 4  ;;  %s2109_s28 = int_to_ptr.vmem [resolvable:$true] %s2108_s28 }
 0x3f0   :  { %1852 = vst [vmem:[#allocation5 + $0x5] sm:$0x1] %v3331_v48  ;;  %v1746_v40 = vpack.c.bf16 %v3331_v48, %v3331_v48  ;;  %s2768_s7 = scalar_lea.vmem %s2109_s28, 128  ;;  %p2773_p1 = scmp.lt.s32.totalorder %s2109_s28, %s2109_s28 }
 0x3f1   :  { %p2769_p0 = scmp.ne.s32.totalorder %s2109_s28, %s2768_s7  ;;  %p2774_p2 = scmp.lt.s32.totalorder %s2768_s7, %s2768_s7 }
 0x3f2   :  { %2479 = vmatpush3.bf16.msra.mxu0 %v2633_v10  ;;  %2497 = vmatpush3.bf16.msra.mxu1 %v2634_v47 }
 0x3f3   :  { %2480 = vmatprep.subr.bf16.mxu0 %v2813_v46  ;;  %2498 = vmatprep.subr.bf16.mxu1 %v2813_v46  ;;  %p2775_p3 = por %p2774_p2, %p2773_p1 }
 0x3f5   :  { %p2776_p4 = pnand %p2775_p3, %p2769_p0 }
 0x3f6   :  { %2481 = vmatpush3.bf16.msra.mxu0 %v2635_v49  ;;  %2499 = vmatpush3.bf16.msra.mxu1 %v2636_v50 }
 0x3f7   :  { %2482 = vmatprep.subr.bf16.mxu0 %v2813_v46  ;;  %2500 = vmatprep.subr.bf16.mxu1 %v2813_v46 }
 0x3fa   :  { %2483 = vmatpush3.bf16.msra.mxu0 %v2637_v51  ;;  %2501 = vmatpush3.bf16.msra.mxu1 %v2638_v52 }
 0x3fb   :  { %2502 = vmatprep.subr.bf16.mxu1 %v2813_v46  ;;  %2508 = vmatprep.subr.bf16.mxu0 %v2813_v46 }
 0x3fd   :  { %2485 = vmatmul.mubr.bf16.vlgmr.msra.gmra.mxu0 %v1389_v12 }
 0x3fe   :  { %2503 = vmatpush3.bf16.msra.mxu1 %v2639_v16  ;;  %2509 = vmatpush3.bf16.msra.mxu0 %v2640_v0 }
 0x3ff   :  { %2510 = vmatprep.subr.bf16.mxu0 %v2813_v46  ;;  %2528 = vmatprep.subr.bf16.mxu1 %v2813_v46 }
 0x400   :  { %2524 = vmatprep.mubr.msk.bf16.mxu0 %vm2814_vm5, %v2813_v46 }
 0x401   :  { %2505 = vmatmul.mubr.bf16.vlgmr.msra.gmra.mxu1 %v1508_v11 }
 0x402   :  { %2511 = vmatpush3.bf16.msra.mxu0 %v2641_v17  ;;  %2529 = vmatpush3.bf16.msra.mxu1 %v2642_v9 }
 0x403   :  { %2512 = vmatprep.subr.bf16.mxu0 %v2813_v46  ;;  %2530 = vmatprep.subr.bf16.mxu1 %v2813_v46 }
 0x404   :  { %2544 = vmatprep.mubr.msk.bf16.mxu1 %vm2814_vm5, %v2813_v46 }
 0x406   :  { %2513 = vmatpush3.bf16.msra.mxu0 %v2643_v13  ;;  %2531 = vmatpush3.bf16.msra.mxu1 %v2644_v53 }
 0x407   :  { %2514 = vmatprep.subr.bf16.mxu0 %v2813_v46  ;;  %2532 = vmatprep.subr.bf16.mxu1 %v2813_v46 }
 0x40a   :  { %2515 = vmatpush3.bf16.msra.mxu0 %v2645_v18  ;;  %2533 = vmatpush3.bf16.msra.mxu1 %v2646_v20 }
 0x40b   :  { %2516 = vmatprep.subr.bf16.mxu0 %v2813_v46  ;;  %2534 = vmatprep.subr.bf16.mxu1 %v2813_v46 }
 0x40e   :  { %2517 = vmatpush3.bf16.msra.mxu0 %v2647_v14  ;;  %2535 = vmatpush3.bf16.msra.mxu1 %v2648_v15 }
 0x40f   :  { %2518 = vmatprep.subr.bf16.mxu0 %v2813_v46  ;;  %2536 = vmatprep.subr.bf16.mxu1 %v2813_v46 }
 0x412   :  { %2519 = vmatpush3.bf16.msra.mxu0 %v2649_v2  ;;  %2537 = vmatpush3.bf16.msra.mxu1 %v2650_v54 }
 0x413   :  { %2520 = vmatprep.subr.bf16.mxu0 %v2813_v46  ;;  %2538 = vmatprep.subr.bf16.mxu1 %v2813_v46 }
 0x416   :  { %2521 = vmatpush3.bf16.msra.mxu0 %v2651_v21  ;;  %2539 = vmatpush3.bf16.msra.mxu1 %v2652_v5 }
 0x417   :  { %2522 = vmatprep.subr.bf16.mxu0 %v2813_v46  ;;  %2540 = vmatprep.subr.bf16.mxu1 %v2813_v46 }
 0x41a   :  { %2523 = vmatpush3.bf16.msra.mxu0 %v2653_v7  ;;  %2541 = vmatpush3.bf16.msra.mxu1 %v2654_v61 }
 0x41b   :  { %2542 = vmatprep.subr.bf16.mxu1 %v2813_v46  ;;  %2548 = vmatprep.subr.bf16.mxu0 %v2813_v46 }
 0x41d   :  { %2525 = vmatmul.mubr.bf16.vlgmr.msra.gmra.mxu0 %v1627_v24 }
 0x41e   :  { %2543 = vmatpush3.bf16.msra.mxu1 %v2655_v19  ;;  %2549 = vmatpush3.bf16.msra.mxu0 %v2656_v22 }
 0x41f   :  { %2550 = vmatprep.subr.bf16.mxu0 %v2813_v46  ;;  %2568 = vmatprep.subr.bf16.mxu1 %v2813_v46 }
 0x420   :  { %2564 = vmatprep.mubr.msk.bf16.mxu0 %vm2814_vm5, %v2813_v46 }
 0x421   :  { %2545 = vmatmul.mubr.bf16.vlgmr.msra.gmra.mxu1 %v1746_v40 }
 0x422   :  { %2551 = vmatpush3.bf16.msra.mxu0 %v2657_v25  ;;  %2569 = vmatpush3.bf16.msra.mxu1 %v2658_v3 }
 0x423   :  { %2552 = vmatprep.subr.bf16.mxu0 %v2813_v46  ;;  %2570 = vmatprep.subr.bf16.mxu1 %v2813_v46 }
 0x424   :  { %2584 = vmatprep.mubr.msk.bf16.mxu1 %vm2814_vm5, %v2813_v46 }
 0x426   :  { %2553 = vmatpush3.bf16.msra.mxu0 %v2659_v4  ;;  %2571 = vmatpush3.bf16.msra.mxu1 %v2660_v1 }
 0x427   :  { %2554 = vmatprep.subr.bf16.mxu0 %v2813_v46  ;;  %2572 = vmatprep.subr.bf16.mxu1 %v2813_v46 }
 0x42a   :  { %2555 = vmatpush3.bf16.msra.mxu0 %v2661_v56  ;;  %2573 = vmatpush3.bf16.msra.mxu1 %v2662_v26 }
 0x42b   :  { %2556 = vmatprep.subr.bf16.mxu0 %v2813_v46  ;;  %2574 = vmatprep.subr.bf16.mxu1 %v2813_v46 }
 0x42e   :  { %2575 = vmatpush3.bf16.msra.mxu1 %v2663_v63  ;;  %2557 = vmatpush3.bf16.msra.mxu0 %v2664_v23 }
 0x42f   :  { %2558 = vmatprep.subr.bf16.mxu0 %v2813_v46  ;;  %2576 = vmatprep.subr.bf16.mxu1 %v2813_v46 }
 0x432   :  { %2559 = vmatpush3.bf16.msra.mxu0 %v2665_v29  ;;  %2577 = vmatpush3.bf16.msra.mxu1 %v2666_v30 }
 0x433   :  { %2560 = vmatprep.subr.bf16.mxu0 %v2813_v46  ;;  %2578 = vmatprep.subr.bf16.mxu1 %v2813_v46 }
 0x436   :  { %2561 = vmatpush3.bf16.msra.mxu0 %v2667_v32  ;;  %2579 = vmatpush3.bf16.msra.mxu1 %v2668_v6 }
 0x437   :  { %2562 = vmatprep.subr.bf16.mxu0 %v2813_v46  ;;  %2580 = vmatprep.subr.bf16.mxu1 %v2813_v46 }
 0x43a   :  { %2563 = vmatpush3.bf16.msra.mxu0 %v2669_v27  ;;  %2581 = vmatpush3.bf16.msra.mxu1 %v2670_v28 }
 0x43b   :  { %2582 = vmatprep.subr.bf16.mxu1 %v2813_v46 }
 0x43e   :  { %2583 = vmatpush3.bf16.msra.mxu1 %v2671_v34 }
 0x470   :  { %v1862_v58 = vpop.xlane.xlu0 %1861 }
 0x471   :  { %2764 = vrcp.f32 %v1862_v58 }
 0x474   :  { %v1981_v60 = vpop.xlane.xlu1 %1980 }
 0x475   :  { %2766 = vrcp.f32 %v1981_v60 }
 0x47e   :  { %v2765_v35 = vpop.eup %2764 }
 0x47f   :  { %v1864_v36 = vmul.f32 %v2765_v35, %v3293_v31 }
 0x481   :  { %v1865_v37 = vpack.c.bf16 %v1864_v36, %v1864_v36  ;;  %1971 = vst [vmem:[#allocation5 + $0x6] sm:$0x1] %v1864_v36 }
 0x482   :  { %v2767_v8 = vpop.eup %2766 }
 0x483   :  { %2565 = vmatmul.mubr.bf16.vlgmr.msra.gmra.mxu0 %v1865_v37  ;;  %v1983_v38 = vmul.f32 %v2767_v8, %v3306_v39 }
 0x485   :  { %v1984_v55 = vpack.c.bf16 %v1983_v38, %v1983_v38  ;;  %2090 = vst [vmem:[#allocation5 + $0x7] sm:$0x1] %v1983_v38 }
 0x487   :  { %2585 = vmatmul.mubr.bf16.vlgmr.msra.gmra.mxu1 %v1984_v55 }
 0x49d   :  { %v1250_v33 = vpop.f32.mrf.mxu0 }
 0x49e   :  { %1258 = vst.msk [vmem:[#allocation3] sm:$0x1] %vm1257_vm6, %v1250_v33 }
 0x49f   :  { %v2446_v46 = vpop.f32.mrf.mxu0 }
 0x4a1   :  { %v1253_v62 = vpop.f32.mrf.mxu0  ;;  %v1370_v41 = vpop.f32.mrf.mxu1 }
 0x4a2   :  { %1377 = vst.msk [vmem:[#allocation3 + $0x1] sm:$0x1] %vm1257_vm6, %v1370_v41 }
 0x4a3   :  { %v2447_v57 = vpop.f32.mrf.mxu0  ;;  %v2466_v31 = vpop.f32.mrf.mxu1 }
 0x4a5   :  { %v1373_v42 = vpop.f32.mrf.mxu1 }
 0x4a7   :  { %v2467_v43 = vpop.f32.mrf.mxu1 }
 0x4bd   :  { %v1489_v44 = vpop.f32.mrf.mxu0 }
 0x4be   :  { %1496 = vst.msk [vmem:[#allocation3 + $0x2] sm:$0x1] %vm1257_vm6, %v1489_v44 }
 0x4bf   :  { %v2486_v39 = vpop.f32.mrf.mxu0 }
 0x4c1   :  { %v1492_v59 = vpop.f32.mrf.mxu0  ;;  %v1608_v45 = vpop.f32.mrf.mxu1 }
 0x4c2   :  { %1615 = vst.msk [vmem:[#allocation3 + $0x3] sm:$0x1] %vm1257_vm6, %v1608_v45 }
 0x4c3   :  { %v2487_v10 = vpop.f32.mrf.mxu0  ;;  %v2506_v47 = vpop.f32.mrf.mxu1 }
 0x4c5   :  { %v1611_v48 = vpop.f32.mrf.mxu1 }
 0x4c7   :  { %v2507_v49 = vpop.f32.mrf.mxu1 }
 0x4c8   :  { %2779 = shalt.err (!%p2776_p4)
}
 0x4c9   :  { %2111 = dma.vmem_to_hbm [thread:$0]  %s2109_s28, 128, %s3523_s11, [#allocation6]  }
 0x4ca   :  { %s2816_s30 = smov [#allocation3]  }
 0x4cb   :  { %s2098_s12 = sshll.u32 %s2816_s30, 4  ;;  %s2099_s12 = int_to_ptr.vmem [resolvable:$true] %s2098_s12 }
 0x4cc   :  { %s2788_s11 = scalar_lea.vmem %s2099_s12, 128  ;;  %p2793_p6 = scmp.lt.s32.totalorder %s2099_s12, %s2099_s12 }
 0x4cd   :  { %p2789_p5 = scmp.ne.s32.totalorder %s2099_s12, %s2788_s11  ;;  %p2794_p7 = scmp.lt.s32.totalorder %s2788_s11, %s2788_s11 }
 0x4cf   :  { %p2795_p8 = por %p2794_p7, %p2793_p6 }
 0x4d1   :  { %p2796_p9 = pnand %p2795_p8, %p2789_p5 }
 0x4dd   :  { %v1727_v50 = vpop.f32.mrf.mxu0 }
 0x4de   :  { %1734 = vst.msk [vmem:[#allocation3 + $0x4] sm:$0x1] %vm1257_vm6, %v1727_v50 }
 0x4df   :  { %v2526_v51 = vpop.f32.mrf.mxu0 }
 0x4e1   :  { %v1730_v52 = vpop.f32.mrf.mxu0  ;;  %v1846_v16 = vpop.f32.mrf.mxu1 }
 0x4e2   :  { %1853 = vst.msk [vmem:[#allocation3 + $0x5] sm:$0x1] %vm1257_vm6, %v1846_v16 }
 0x4e3   :  { %v2527_v0 = vpop.f32.mrf.mxu0  ;;  %v2546_v12 = vpop.f32.mrf.mxu1 }
 0x4e5   :  { %v1849_v17 = vpop.f32.mrf.mxu1 }
 0x4e7   :  { %v2547_v9 = vpop.f32.mrf.mxu1 }
 0x543   :  { %v1965_v11 = vpop.f32.mrf.mxu0 }
 0x544   :  { %1972 = vst.msk [vmem:[#allocation3 + $0x6] sm:$0x1] %vm1257_vm6, %v1965_v11 }
 0x545   :  { %v2566_v13 = vpop.f32.mrf.mxu0 }
 0x547   :  { %v1968_v53 = vpop.f32.mrf.mxu0  ;;  %v2084_v18 = vpop.f32.mrf.mxu1 }
 0x548   :  { %2091 = vst.msk [vmem:[#allocation3 + $0x7] sm:$0x1] %vm1257_vm6, %v2084_v18 }
 0x549   :  { %v2567_v20 = vpop.f32.mrf.mxu0  ;;  %v2586_v14 = vpop.f32.mrf.mxu1 }
 0x54a   :  { %2799 = shalt.err (!%p2796_p9)
}
 0x54b   :  { %2101 = dma.vmem_to_hbm [thread:$0]  %s2099_s12, 128, %s3522_s10, [#allocation4]   ;;  %v2087_v15 = vpop.f32.mrf.mxu1 }
 0x54d   :  { %v2587_v2 = vpop.f32.mrf.mxu1 }
 0x54e   :  { %2808 = dma.done.wait [#allocation4], 128  }
 0x54f   :  { %2809 = vsyncadd [#allocation4], 4294967168 }
 0x550   :  { %2810 = dma.done.wait [#allocation6], 128  }
 0x551   :  { %2811 = vsyncadd [#allocation6], 4294967168 }
 0x552   :  { %2118 = vsyncpa [#allocation4], 1 }
 0x553   :  { %2119 = vsyncpa [#allocation6], 1 }

</bundles_post_ra>
